<compile_context>
chip_gen: v7x
topology: tpu7x:2x2x1
jax: 0.10.0
libtpu: 0.0.40
codegen_flags: <defaults>
</compile_context>

<pallas_src>
import jax
import jax.numpy as jnp
from jax.experimental import pallas as pl
from jax.experimental.pallas import tpu as pltpu

EPS = 1e-5          # PyTorch LayerNorm default eps
BIG = 1e30          # sentinel for padded bucketize boundaries
LR_CHUNK = 512      # LengthRegulator frame-chunk (tile over max_len)


# ---------------------------------------------------------------------------
# Fused kernel: Bb sequences per grid step, everything stays in VMEM.
# ---------------------------------------------------------------------------
def fused_variance_adaptor_kernel(
        x_ref, aux_ref, dur_ref,
        w1_ref, b1_ref, g1_ref, be1_ref,
        w2_ref, b2_ref, g2_ref, be2_ref,
        wl_ref, bl_ref, bins_ref, tab_ref,
        xout_ref, pred_ref):
    M, H = x_ref.shape                       # M = Bb * T tokens in this block
    Bb = dur_ref.shape[0]
    T = M // Bb
    ML = xout_ref.shape[1]

    x = x_ref[...]                           # (M, H) f32
    aux = aux_ref[...]                       # (M, 3) f32: [mask, ptgt, etgt]
    mask_col = aux[:, 0:1]                   # 1.0 = padding token
    ptgt = aux[:, 1:2]
    etgt = aux[:, 2:3]

    # "first / last token of its sequence" masks (sequences are length-T row
    # groups inside the batched (M, .) block); they zero the k=3 conv taps that
    # would otherwise read across a sequence boundary.
    tok = jax.lax.broadcasted_iota(jnp.int32, (M, 1), 0)
    t_in_seq = tok % T
    is_first = t_in_seq == 0
    is_last = t_in_seq == T - 1

    def shift3(v):
        # v: (M, C).  prev[t] = v[t-1], next[t] = v[t+1] within each length-T
        # sequence, zero at sequence boundaries (sublane shift + boundary mask,
        # no lane concatenation).
        c = v.shape[1]
        z = jnp.zeros((1, c), v.dtype)
        down = jnp.concatenate([z, v[:M - 1, :]], axis=0)
        up = jnp.concatenate([v[1:, :], z], axis=0)
        prev = jnp.where(is_first, jnp.zeros_like(v), down)
        nxt = jnp.where(is_last, jnp.zeros_like(v), up)
        return prev, nxt

    def layer_norm(h, g, be):                # f32 statistics (VPU/EUP)
        mu = jnp.mean(h, axis=-1, keepdims=True)
        var = jnp.mean(jnp.square(h - mu), axis=-1, keepdims=True)
        return (h - mu) * jax.lax.rsqrt(var + EPS) * g + be

    def conv3(cen, prv, nxt, w_ref, b_ref, p):
        # k=3 / pad=1 Conv1d as 3 accumulating MXU matmuls on shifted operands
        # (bf16 operands, f32 accumulation).
        acc = jnp.dot(cen, w_ref[p, 1], preferred_element_type=jnp.float32)
        acc = acc + jnp.dot(prv, w_ref[p, 0], preferred_element_type=jnp.float32)
        acc = acc + jnp.dot(nxt, w_ref[p, 2], preferred_element_type=jnp.float32)
        return acc + b_ref[p]

    def predictor(cen, prv, nxt, p):
        # Conv1d(k=3) -> ReLU -> LayerNorm -> Conv1d(k=3) -> ReLU -> LayerNorm
        # -> Linear(F,1); dropout = identity (inference).
        h = layer_norm(jnp.maximum(conv3(cen, prv, nxt, w1_ref, b1_ref, p), 0.0),
                       g1_ref[p], be1_ref[p])
        hc = h.astype(jnp.bfloat16)
        hp, hn = shift3(hc)
        h = layer_norm(jnp.maximum(conv3(hc, hp, hn, w2_ref, b2_ref, p), 0.0),
                       g2_ref[p], be2_ref[p])
        # Linear(F,1) as a VPU multiply + lane reduction (no N=1 MXU dot);
        # masked_fill(src_mask, 0) fused here.
        pred = jnp.sum(h * wl_ref[p], axis=-1, keepdims=True) + bl_ref[p]
        return jnp.where(mask_col > 0.5, 0.0, pred)          # (M, 1) f32

    def embed_add(xf, tgt, e):
        # torch.bucketize(tgt, bins) + nn.Embedding as an interval-membership
        # one-hot (lo_i < tgt <= hi_i) times the 128-row zero-padded table.
        lo = bins_ref[e, 0:1, :]                             # (1, NBP)
        hi = bins_ref[e, 1:2, :]                             # (1, NBP)
        onehot = jnp.logical_and(lo < tgt, tgt <= hi)        # (M, NBP)
        emb = jnp.dot(onehot.astype(jnp.bfloat16), tab_ref[e],
                      preferred_element_type=jnp.float32)    # (M, H)
        return xf + emb

    # --- predictors + residual embedding adds (module ordering preserved) ---
    xc = x.astype(jnp.bfloat16)
    xp, xn = shift3(xc)
    pred_ref[:, 0:1] = predictor(xc, xp, xn, 0)   # log-duration prediction
    pred_ref[:, 1:2] = predictor(xc, xp, xn, 1)   # pitch prediction (pre-add x)
    x = embed_add(x, ptgt, 0)                     # x += pitch embedding
    xc = x.astype(jnp.bfloat16)
    xp, xn = shift3(xc)
    pred_ref[:, 2:3] = predictor(xc, xp, xn, 2)   # energy prediction (post-add x)
    x = embed_add(x, etgt, 1)                     # x += energy embedding

    # --- LengthRegulator: token t of sequence b covers frames
    #     [cum_excl[b,t], cum_incl[b,t]); frames past sum(dur) stay zero. ------
    x_bf = x.astype(jnp.bfloat16)
    for b in range(Bb):                           # static, Bb is small
        xb = x_bf[b * T:(b + 1) * T, :]           # (T, H)
        ce = dur_ref[b, 0:1, :]                   # (1, T) exclusive cumsum
        ci = dur_ref[b, 1:2, :]                   # (1, T) inclusive cumsum
        for c0 in range(0, ML, LR_CHUNK):         # static tiling over max_len
            cs = min(LR_CHUNK, ML - c0)
            fr = c0 + jax.lax.broadcasted_iota(jnp.int32, (cs, T), 0)
            onehot = jnp.logical_and(ce <= fr, fr < ci).astype(jnp.bfloat16)
            xout_ref[b, c0:c0 + cs, :] = jnp.dot(
                onehot, xb, preferred_element_type=jnp.float32)


# ---------------------------------------------------------------------------
# VMEM budget: ~75% of physical capacity, capped at 96 MiB
# (v5e/v6e: 96 MiB, v7x: 48 MiB).  Falls back to a v7x-safe 48 MiB.
# ---------------------------------------------------------------------------
def _pick_vmem_limit():
    try:
        cap = pltpu.get_tpu_info().vmem_capacity_bytes
        return int(min(96 * 1024 * 1024, (cap * 3) // 4))
    except Exception:
        return 48 * 1024 * 1024


# ---------------------------------------------------------------------------
# Wrapper: full VarianceAdaptor_Discriminator forward
# (phoneme-level pitch/energy, duration_target provided).
# ---------------------------------------------------------------------------
def variance_adaptor_forward(params, x, src_mask, pitch_target, energy_target,
                             duration_target, max_len,
                             p_control=1.0, e_control=1.0, d_control=1.0,
                             mel_mask=None, batch_block=4):
    del p_control, e_control, d_control   # unused when targets are provided
    B, T, H = x.shape

    # batch block Bb = largest divisor of B that does not exceed batch_block.
    bb = max(d for d in range(1, min(batch_block, B) + 1) if B % d == 0)
    M = bb * T
    assert (M % 8 == 0) or (bb == B), "Bb*T should be a multiple of 8"

    # token-major inputs
    x2 = x.astype(jnp.float32).reshape(B * T, H)
    aux = jnp.stack([src_mask.astype(jnp.float32),
                     pitch_target.astype(jnp.float32),
                     energy_target.astype(jnp.float32)],
                    axis=-1).reshape(B * T, 3)
    dur = duration_target.astype(jnp.int32)
    cum = jnp.cumsum(dur, axis=-1)                     # hoisted out of kernel
    durs = jnp.stack([cum - dur, cum], axis=1)         # (B, 2, T) int32

    # bf16 MXU operands, f32 everything else
    w1 = params["w1"].astype(jnp.bfloat16)
    w2 = params["w2"].astype(jnp.bfloat16)
    tables = params["tables"].astype(jnp.bfloat16)

    def rep(arr):                         # replicated (batch-invariant) operand
        nd = arr.ndim
        return pl.BlockSpec(arr.shape, lambda i, nd=nd: (0,) * nd)

    in_arrays = [x2, aux, durs,
                 w1, params["b1"], params["g1"], params["be1"],
                 w2, params["b2"], params["g2"], params["be2"],
                 params["wl"], params["bl"], params["bins"], tables]
    in_specs = ([pl.BlockSpec((M, H), lambda i: (i, 0)),
                 pl.BlockSpec((M, 3), lambda i: (i, 0)),
                 pl.BlockSpec((bb, 2, T), lambda i: (i, 0, 0))]
                + [rep(a) for a in in_arrays[3:]])

    out_shape = (
        jax.ShapeDtypeStruct((B, max_len, H), jnp.float32),   # expanded x
        jax.ShapeDtypeStruct((B * T, 3), jnp.float32),        # [logdur,pitch,energy]
    )
    out_specs = (
        pl.BlockSpec((bb, max_len, H), lambda i: (i, 0, 0)),
        pl.BlockSpec((M, 3), lambda i: (i, 0)),
    )

    x_out, preds = pl.pallas_call(
        fused_variance_adaptor_kernel,
        out_shape=out_shape,
        grid=(B // bb,),
        in_specs=in_specs,
        out_specs=out_specs,
        compiler_params=pltpu.CompilerParams(
            dimension_semantics=("parallel",),
            vmem_limit_bytes=_pick_vmem_limit()),
    )(*in_arrays)

    preds = preds.reshape(B, T, 3)
    log_duration_prediction = preds[..., 0]
    pitch_prediction = preds[..., 1]
    energy_prediction = preds[..., 2]
    mel_len = jnp.sum(duration_target, axis=-1).astype(jnp.int32)
    duration_rounded = duration_target
    # TODO(synk): LengthRegulator's positional-encoding output `pe` is computed
    # and then discarded by VarianceAdaptor_Discriminator.forward; not materialized.
    return (x_out, pitch_prediction, energy_prediction, log_duration_prediction,
            duration_rounded, mel_len, mel_mask)


# ---------------------------------------------------------------------------
# Deterministic parameter construction (stacked: 0=duration, 1=pitch, 2=energy).
# NOTE: for real model configs keep H, F multiples of 128 (lane occupancy).
# ---------------------------------------------------------------------------
def init_params(key, H, F, n_bins, nbp=128):
    ks = jax.random.split(key, 12)

    def xavier(k, shape, fan_in, fan_out):
        scale = jnp.sqrt(2.0 / (fan_in + fan_out))
        return jax.random.normal(k, shape, jnp.float32) * scale

    def small(k, shape):
        return jax.random.normal(k, shape, jnp.float32) * 0.1

    # Conv weights stored per tap: (predictor, tap[-1,0,+1], Cin, Cout).
    # A PyTorch Conv1d weight (Cout, Cin, K) maps via w.permute(2, 1, 0).
    w1 = xavier(ks[0], (3, 3, H, F), 3 * H, F).astype(jnp.bfloat16)
    w2 = xavier(ks[1], (3, 3, F, F), 3 * F, F).astype(jnp.bfloat16)
    wl = xavier(ks[2], (3, 1, F), F, 1)     # Linear(F,1) weight stored as a row

    params = dict(
        w1=w1, b1=small(ks[3], (3, 1, F)),
        g1=1.0 + small(ks[4], (3, 1, F)), be1=small(ks[5], (3, 1, F)),
        w2=w2, b2=small(ks[6], (3, 1, F)),
        g2=1.0 + small(ks[7], (3, 1, F)), be2=small(ks[8], (3, 1, F)),
        wl=wl, bl=small(ks[9], (3, 1, 1)),
    )

    # TODO(synk): stats.json pitch/energy min/max replaced by synthetic linear bins.
    # lo/hi interval boundaries, lane-padded so padded lanes never match.
    def make_bins(lo_val, hi_val):
        edges = jnp.linspace(lo_val, hi_val, n_bins - 1).astype(jnp.float32)
        hi = jnp.concatenate(
            [edges, jnp.full((nbp - (n_bins - 1),), BIG, jnp.float32)])
        lo = jnp.concatenate(
            [jnp.array([-BIG], jnp.float32), edges,
             jnp.full((nbp - n_bins,), BIG, jnp.float32)])
        return jnp.stack([lo, hi])                              # (2, NBP)

    params["bins"] = jnp.stack([make_bins(-2.0, 2.0), make_bins(-2.0, 2.0)])
    tab = small(ks[10], (2, n_bins, H))
    params["tables"] = jnp.concatenate(                         # (2, NBP, H)
        [tab, jnp.zeros((2, nbp - n_bins, H), jnp.float32)],
        axis=1).astype(jnp.bfloat16)
    return params


# ---------------------------------------------------------------------------
# Pure-JAX reference (independent implementation) for correctness checking.
# ---------------------------------------------------------------------------
def reference_forward(params, x, src_mask, pitch_target, energy_target,
                      duration_target, max_len, n_bins):
    B, T, H = x.shape
    Fd = params["w2"].shape[-1]
    PH = jax.lax.Precision.HIGHEST
    w1 = params["w1"].astype(jnp.float32)          # (3, 3, H, F)
    w2 = params["w2"].astype(jnp.float32)
    tables = params["tables"].astype(jnp.float32)  # (2, NBP, H)

    def conv(inp, w, bias):                        # w: (3, Cin, F)
        padded = jnp.pad(inp, ((1, 1), (0, 0)))
        out = bias
        for k in range(3):
            out = out + jnp.dot(padded[k:k + T], w[k], precision=PH)
        return out

    def layer_norm(h, g, be):
        mu = jnp.mean(h, axis=-1, keepdims=True)
        var = jnp.mean((h - mu) ** 2, axis=-1, keepdims=True)
        return (h - mu) / jnp.sqrt(var + EPS) * g + be

    def predictor(inp, p, mask_b):
        h = layer_norm(jax.nn.relu(conv(inp, w1[p], params["b1"][p])),
                       params["g1"][p], params["be1"][p])
        h = layer_norm(jax.nn.relu(conv(h, w2[p], params["b2"][p])),
                       params["g2"][p], params["be2"][p])
        pred = (h @ params["wl"][p].reshape(Fd, 1) + params["bl"][p])[:, 0]
        return jnp.where(mask_b, 0.0, pred)

    def embed_add(inp, tgt_b, e):
        edges = params["bins"][e, 1, :n_bins - 1]
        idx = jnp.searchsorted(edges, tgt_b, side="left")   # == torch.bucketize
        return inp + tables[e][idx]

    xs, dps, pps, eps_, lens = [], [], [], [], []
    for b in range(B):
        xb, mb = x[b], src_mask[b]
        dps.append(predictor(xb, 0, mb))
        pps.append(predictor(xb, 1, mb))
        xb = embed_add(xb, pitch_target[b], 0)
        eps_.append(predictor(xb, 2, mb))
        xb = embed_add(xb, energy_target[b], 1)
        dur_b = duration_target[b]
        exp_b = jnp.repeat(xb, dur_b, axis=0, total_repeat_length=max_len)
        frames = jnp.arange(max_len)[:, None]
        exp_b = jnp.where(frames < jnp.sum(dur_b), exp_b, 0.0)
        xs.append(exp_b)
        lens.append(jnp.sum(dur_b))
    return (jnp.stack(xs), jnp.stack(pps), jnp.stack(eps_), jnp.stack(dps),
            jnp.stack(lens).astype(jnp.int32))


if __name__ == "__main__":
    B, T, H, F = 2, 8, 32, 32            # encoder_hidden = filter_size = 32
    n_bins = 16
    max_len = 24

    key = jax.random.PRNGKey(0)
    kp, kx, kpt, ket = jax.random.split(key, 4)

    params = init_params(kp, H, F, n_bins)

    x = jax.random.normal(kx, (B, T, H), jnp.float32)
    src_lens = jnp.array([8, 6], jnp.int32)
    src_mask = jnp.arange(T)[None, :] >= src_lens[:, None]      # True = padding
    pitch_target = jax.random.normal(kpt, (B, T), jnp.float32)
    energy_target = jax.random.normal(ket, (B, T), jnp.float32)
    duration_target = jnp.array([[3, 2, 1, 4, 2, 3, 1, 2],
                                 [2, 2, 2, 2, 3, 1, 0, 0]], jnp.int32)

    outs = variance_adaptor_forward(params, x, src_mask, pitch_target,
                                    energy_target, duration_target, max_len)
    (x_out, pitch_pred, energy_pred, log_dur_pred,
     dur_rounded, mel_len, mel_mask) = outs

    jax.block_until_ready(x_out)
    jax.block_until_ready(pitch_pred)
    jax.block_until_ready(energy_pred)
    jax.block_until_ready(log_dur_pred)
    jax.block_until_ready(mel_len)

    assert x_out.shape == (B, max_len, H)
    assert pitch_pred.shape == (B, T)
    assert energy_pred.shape == (B, T)
    assert log_dur_pred.shape == (B, T)
    assert mel_len.shape == (B,)

    ref_x, ref_pp, ref_ep, ref_dp, ref_len = reference_forward(
        params, x, src_mask, pitch_target, energy_target,
        duration_target, max_len, n_bins)

    assert jnp.allclose(x_out, ref_x, atol=5e-2, rtol=5e-2)
    assert jnp.allclose(pitch_pred, ref_pp, atol=5e-2, rtol=5e-2)
    assert jnp.allclose(energy_pred, ref_ep, atol=5e-2, rtol=5e-2)
    assert jnp.allclose(log_dur_pred, ref_dp, atol=5e-2, rtol=5e-2)
    assert jnp.array_equal(mel_len, ref_len)

    print("KERNEL_OK")
</pallas_src>

<mosaic_0001>
module attributes {stable_mosaic.version = 11 : i64} {
  func.func @fused_variance_adaptor_kernel(%arg0: i32, %arg1: memref<16x32xf32, #tpu.memory_space<vmem>>, %arg2: memref<16x3xf32, #tpu.memory_space<vmem>>, %arg3: memref<2x2x8xi32, #tpu.memory_space<vmem>>, %arg4: memref<3x3x32x32xbf16, #tpu.memory_space<vmem>>, %arg5: memref<3x1x32xf32, #tpu.memory_space<vmem>>, %arg6: memref<3x1x32xf32, #tpu.memory_space<vmem>>, %arg7: memref<3x1x32xf32, #tpu.memory_space<vmem>>, %arg8: memref<3x3x32x32xbf16, #tpu.memory_space<vmem>>, %arg9: memref<3x1x32xf32, #tpu.memory_space<vmem>>, %arg10: memref<3x1x32xf32, #tpu.memory_space<vmem>>, %arg11: memref<3x1x32xf32, #tpu.memory_space<vmem>>, %arg12: memref<3x1x32xf32, #tpu.memory_space<vmem>>, %arg13: memref<3x1x1xf32, #tpu.memory_space<vmem>>, %arg14: memref<2x2x128xf32, #tpu.memory_space<vmem>>, %arg15: memref<2x128x32xbf16, #tpu.memory_space<vmem>>, %arg16: memref<2x24x32xf32, #tpu.memory_space<vmem>>, %arg17: memref<16x3xf32, #tpu.memory_space<vmem>>) attributes {dimension_semantics = [#tpu.dimension_semantics<parallel>], iteration_bounds = array<i64: 1>, scalar_prefetch = 0 : i64, scratch_operands = 0 : i64, tpu.core_type = #tpu.core_type<tc>, window_params = [{transform_indices = @transform_0, window_bounds = array<i64: 16, 32>}, {transform_indices = @transform_1, window_bounds = array<i64: 16, 3>}, {transform_indices = @transform_2, window_bounds = array<i64: 2, 2, 8>}, {pipeline_mode = #tpu.pipeline_mode<synchronous>, transform_indices = @transform_3, window_bounds = array<i64: 3, 3, 32, 32>}, {pipeline_mode = #tpu.pipeline_mode<synchronous>, transform_indices = @transform_4, window_bounds = array<i64: 3, 1, 32>}, {pipeline_mode = #tpu.pipeline_mode<synchronous>, transform_indices = @transform_5, window_bounds = array<i64: 3, 1, 32>}, {pipeline_mode = #tpu.pipeline_mode<synchronous>, transform_indices = @transform_6, window_bounds = array<i64: 3, 1, 32>}, {pipeline_mode = #tpu.pipeline_mode<synchronous>, transform_indices = @transform_7, window_bounds = array<i64: 3, 3, 32, 32>}, {pipeline_mode = #tpu.pipeline_mode<synchronous>, transform_indices = @transform_8, window_bounds = array<i64: 3, 1, 32>}, {pipeline_mode = #tpu.pipeline_mode<synchronous>, transform_indices = @transform_9, window_bounds = array<i64: 3, 1, 32>}, {pipeline_mode = #tpu.pipeline_mode<synchronous>, transform_indices = @transform_10, window_bounds = array<i64: 3, 1, 32>}, {pipeline_mode = #tpu.pipeline_mode<synchronous>, transform_indices = @transform_11, window_bounds = array<i64: 3, 1, 32>}, {pipeline_mode = #tpu.pipeline_mode<synchronous>, transform_indices = @transform_12, window_bounds = array<i64: 3, 1, 1>}, {pipeline_mode = #tpu.pipeline_mode<synchronous>, transform_indices = @transform_13, window_bounds = array<i64: 2, 2, 128>}, {pipeline_mode = #tpu.pipeline_mode<synchronous>, transform_indices = @transform_14, window_bounds = array<i64: 2, 128, 32>}, {transform_indices = @transform_15, window_bounds = array<i64: 2, 24, 32>}, {transform_indices = @transform_16, window_bounds = array<i64: 16, 3>}]} {
    %c0 = arith.constant 0 : index
    %c0_0 = arith.constant 0 : index
    %0 = vector.load %arg1[%c0, %c0_0] : memref<16x32xf32, #tpu.memory_space<vmem>>, vector<16x32xf32>
    %c0_1 = arith.constant 0 : index
    %c0_2 = arith.constant 0 : index
    %1 = vector.load %arg2[%c0_1, %c0_2] : memref<16x3xf32, #tpu.memory_space<vmem>>, vector<16x3xf32>
    %2 = vector.extract_strided_slice %1 {offsets = [0, 0], sizes = [16, 1], strides = [1, 1]} : vector<16x3xf32> to vector<16x1xf32>
    %3 = vector.extract_strided_slice %1 {offsets = [0, 1], sizes = [16, 1], strides = [1, 1]} : vector<16x3xf32> to vector<16x1xf32>
    %4 = vector.extract_strided_slice %1 {offsets = [0, 2], sizes = [16, 1], strides = [1, 1]} : vector<16x3xf32> to vector<16x1xf32>
    %5 = tpu.iota {dimensions = array<i32: 0>} : vector<16x1xi32>
    %c8_i32 = arith.constant 8 : i32
    %c0_i32 = arith.constant 0 : i32
    %6 = arith.cmpi eq, %c8_i32, %c0_i32 : i32
    %c1_i32 = arith.constant 1 : i32
    %7 = arith.select %6, %c1_i32, %c8_i32 : i32
    %8 = vector.broadcast %7 : i32 to vector<16x1xi32>
    %9 = arith.remsi %5, %8 : vector<16x1xi32>
    %c0_i32_3 = arith.constant 0 : i32
    %10 = vector.broadcast %c0_i32_3 : i32 to vector<16x1xi32>
    %11 = arith.cmpi ne, %9, %10 : vector<16x1xi32>
    %c0_i32_4 = arith.constant 0 : i32
    %12 = vector.broadcast %c0_i32_4 : i32 to vector<16x1xi32>
    %13 = arith.cmpi slt, %9, %12 : vector<16x1xi32>
    %c0_i32_5 = arith.constant 0 : i32
    %14 = arith.cmpi slt, %7, %c0_i32_5 : i32
    %15 = vector.broadcast %14 : i1 to vector<16x1xi1>
    %16 = vector.broadcast %15 : vector<16x1xi1> to vector<16x1xi1>
    %17 = arith.xori %13, %16 : vector<16x1xi1>
    %18 = arith.andi %17, %11 : vector<16x1xi1>
    %19 = vector.broadcast %7 : i32 to vector<16x1xi32>
    %20 = arith.addi %9, %19 : vector<16x1xi32>
    %21 = arith.select %18, %20, %9 : vector<16x1xi1>, vector<16x1xi32>
    %c0_i32_6 = arith.constant 0 : i32
    %22 = vector.broadcast %c0_i32_6 : i32 to vector<16x1xi32>
    %23 = arith.cmpi eq, %21, %22 : vector<16x1xi32>
    %c7_i32 = arith.constant 7 : i32
    %24 = vector.broadcast %c7_i32 : i32 to vector<16x1xi32>
    %25 = arith.cmpi eq, %21, %24 : vector<16x1xi32>
    %26 = arith.truncf %0 : vector<16x32xf32> to vector<16x32xbf16>
    %cst = arith.constant 0.000000e+00 : bf16
    %27 = vector.broadcast %cst : bf16 to vector<1x32xbf16>
    %28 = vector.extract_strided_slice %26 {offsets = [0, 0], sizes = [15, 32], strides = [1, 1]} : vector<16x32xbf16> to vector<15x32xbf16>
    %29 = tpu.concatenate %27, %28 in 0 : vector<1x32xbf16>, vector<15x32xbf16> -> vector<16x32xbf16>
    %30 = vector.extract_strided_slice %26 {offsets = [1, 0], sizes = [15, 32], strides = [1, 1]} : vector<16x32xbf16> to vector<15x32xbf16>
    %31 = tpu.concatenate %30, %27 in 0 : vector<15x32xbf16>, vector<1x32xbf16> -> vector<16x32xbf16>
    %cst_7 = arith.constant 0.000000e+00 : bf16
    %32 = vector.broadcast %cst_7 : bf16 to vector<16x32xbf16>
    %33 = vector.shape_cast %23 : vector<16x1xi1> to vector<16x1xi1>
    %34 = vector.broadcast %33 : vector<16x1xi1> to vector<16x32xi1>
    %35 = arith.select %34, %32, %29 : vector<16x32xi1>, vector<16x32xbf16>
    %cst_8 = arith.constant 0.000000e+00 : bf16
    %36 = vector.broadcast %cst_8 : bf16 to vector<16x32xbf16>
    %37 = vector.shape_cast %25 : vector<16x1xi1> to vector<16x1xi1>
    %38 = vector.broadcast %37 : vector<16x1xi1> to vector<16x32xi1>
    %39 = arith.select %38, %36, %31 : vector<16x32xi1>, vector<16x32xbf16>
    %c0_9 = arith.constant 0 : index
    %c1 = arith.constant 1 : index
    %c0_10 = arith.constant 0 : index
    %c0_11 = arith.constant 0 : index
    %40 = vector.load %arg4[%c0_9, %c1, %c0_10, %c0_11] : memref<3x3x32x32xbf16, #tpu.memory_space<vmem>>, vector<1x1x32x32xbf16>
    %41 = vector.shape_cast %40 : vector<1x1x32x32xbf16> to vector<32x32xbf16>
    %cst_12 = arith.constant dense<0.000000e+00> : vector<16x32xf32>
    %42 = tpu.matmul %26, %41, %cst_12 {dimension_numbers = #tpu.dot_dimension_numbers<[1], [0], [0], [1], [0, 0, 1, 1], [], []>} : vector<16x32xbf16>, vector<32x32xbf16>, vector<16x32xf32> -> vector<16x32xf32>
    %c0_13 = arith.constant 0 : index
    %c0_14 = arith.constant 0 : index
    %c0_15 = arith.constant 0 : index
    %c0_16 = arith.constant 0 : index
    %43 = vector.load %arg4[%c0_13, %c0_14, %c0_15, %c0_16] : memref<3x3x32x32xbf16, #tpu.memory_space<vmem>>, vector<1x1x32x32xbf16>
    %44 = vector.shape_cast %43 : vector<1x1x32x32xbf16> to vector<32x32xbf16>
    %cst_17 = arith.constant dense<0.000000e+00> : vector<16x32xf32>
    %45 = tpu.matmul %35, %44, %cst_17 {dimension_numbers = #tpu.dot_dimension_numbers<[1], [0], [0], [1], [0, 0, 1, 1], [], []>} : vector<16x32xbf16>, vector<32x32xbf16>, vector<16x32xf32> -> vector<16x32xf32>
    %46 = arith.addf %42, %45 : vector<16x32xf32>
    %c0_18 = arith.constant 0 : index
    %c2 = arith.constant 2 : index
    %c0_19 = arith.constant 0 : index
    %c0_20 = arith.constant 0 : index
    %47 = vector.load %arg4[%c0_18, %c2, %c0_19, %c0_20] : memref<3x3x32x32xbf16, #tpu.memory_space<vmem>>, vector<1x1x32x32xbf16>
    %48 = vector.shape_cast %47 : vector<1x1x32x32xbf16> to vector<32x32xbf16>
    %cst_21 = arith.constant dense<0.000000e+00> : vector<16x32xf32>
    %49 = tpu.matmul %39, %48, %cst_21 {dimension_numbers = #tpu.dot_dimension_numbers<[1], [0], [0], [1], [0, 0, 1, 1], [], []>} : vector<16x32xbf16>, vector<32x32xbf16>, vector<16x32xf32> -> vector<16x32xf32>
    %50 = arith.addf %46, %49 : vector<16x32xf32>
    %c0_22 = arith.constant 0 : index
    %c0_23 = arith.constant 0 : index
    %c0_24 = arith.constant 0 : index
    %51 = vector.load %arg5[%c0_22, %c0_23, %c0_24] : memref<3x1x32xf32, #tpu.memory_space<vmem>>, vector<1x1x32xf32>
    %52 = vector.shape_cast %51 : vector<1x1x32xf32> to vector<1x32xf32>
    %53 = vector.broadcast %52 : vector<1x32xf32> to vector<16x32xf32>
    %54 = arith.addf %50, %53 : vector<16x32xf32>
    %cst_25 = arith.constant 0.000000e+00 : f32
    %55 = vector.broadcast %cst_25 : f32 to vector<16x32xf32>
    %56 = arith.maximumf %54, %55 : vector<16x32xf32>
    %c0_26 = arith.constant 0 : index
    %c0_27 = arith.constant 0 : index
    %c0_28 = arith.constant 0 : index
    %57 = vector.load %arg6[%c0_26, %c0_27, %c0_28] : memref<3x1x32xf32, #tpu.memory_space<vmem>>, vector<1x1x32xf32>
    %58 = vector.shape_cast %57 : vector<1x1x32xf32> to vector<1x32xf32>
    %c0_29 = arith.constant 0 : index
    %c0_30 = arith.constant 0 : index
    %c0_31 = arith.constant 0 : index
    %59 = vector.load %arg7[%c0_29, %c0_30, %c0_31] : memref<3x1x32xf32, #tpu.memory_space<vmem>>, vector<1x1x32xf32>
    %60 = vector.shape_cast %59 : vector<1x1x32xf32> to vector<1x32xf32>
    %cst_32 = arith.constant dense<0.000000e+00> : vector<16xf32>
    %61 = vector.multi_reduction <add>, %56, %cst_32 [1] : vector<16x32xf32> to vector<16xf32>
    %62 = vector.shape_cast %61 : vector<16xf32> to vector<16x1xf32>
    %cst_33 = arith.constant 3.200000e+01 : f32
    %63 = vector.broadcast %cst_33 : f32 to vector<16x1xf32>
    %64 = arith.divf %62, %63 : vector<16x1xf32>
    %65 = vector.broadcast %64 : vector<16x1xf32> to vector<16x32xf32>
    %66 = arith.subf %56, %65 : vector<16x32xf32>
    %67 = arith.mulf %66, %66 : vector<16x32xf32>
    %cst_34 = arith.constant dense<0.000000e+00> : vector<16xf32>
    %68 = vector.multi_reduction <add>, %67, %cst_34 [1] : vector<16x32xf32> to vector<16xf32>
    %69 = vector.shape_cast %68 : vector<16xf32> to vector<16x1xf32>
    %cst_35 = arith.constant 3.200000e+01 : f32
    %70 = vector.broadcast %cst_35 : f32 to vector<16x1xf32>
    %71 = arith.divf %69, %70 : vector<16x1xf32>
    %72 = vector.broadcast %64 : vector<16x1xf32> to vector<16x32xf32>
    %73 = arith.subf %56, %72 : vector<16x32xf32>
    %cst_36 = arith.constant 9.99999974E-6 : f32
    %74 = vector.broadcast %cst_36 : f32 to vector<16x1xf32>
    %75 = arith.addf %71, %74 : vector<16x1xf32>
    %76 = math.rsqrt %75 : vector<16x1xf32>
    %77 = vector.broadcast %76 : vector<16x1xf32> to vector<16x32xf32>
    %78 = arith.mulf %73, %77 : vector<16x32xf32>
    %79 = vector.broadcast %58 : vector<1x32xf32> to vector<16x32xf32>
    %80 = arith.mulf %78, %79 : vector<16x32xf32>
    %81 = vector.broadcast %60 : vector<1x32xf32> to vector<16x32xf32>
    %82 = arith.addf %80, %81 : vector<16x32xf32>
    %83 = arith.truncf %82 : vector<16x32xf32> to vector<16x32xbf16>
    %cst_37 = arith.constant 0.000000e+00 : bf16
    %84 = vector.broadcast %cst_37 : bf16 to vector<1x32xbf16>
    %85 = vector.extract_strided_slice %83 {offsets = [0, 0], sizes = [15, 32], strides = [1, 1]} : vector<16x32xbf16> to vector<15x32xbf16>
    %86 = tpu.concatenate %84, %85 in 0 : vector<1x32xbf16>, vector<15x32xbf16> -> vector<16x32xbf16>
    %87 = vector.extract_strided_slice %83 {offsets = [1, 0], sizes = [15, 32], strides = [1, 1]} : vector<16x32xbf16> to vector<15x32xbf16>
    %88 = tpu.concatenate %87, %84 in 0 : vector<15x32xbf16>, vector<1x32xbf16> -> vector<16x32xbf16>
    %cst_38 = arith.constant 0.000000e+00 : bf16
    %89 = vector.broadcast %cst_38 : bf16 to vector<16x32xbf16>
    %90 = vector.shape_cast %23 : vector<16x1xi1> to vector<16x1xi1>
    %91 = vector.broadcast %90 : vector<16x1xi1> to vector<16x32xi1>
    %92 = arith.select %91, %89, %86 : vector<16x32xi1>, vector<16x32xbf16>
    %cst_39 = arith.constant 0.000000e+00 : bf16
    %93 = vector.broadcast %cst_39 : bf16 to vector<16x32xbf16>
    %94 = vector.shape_cast %25 : vector<16x1xi1> to vector<16x1xi1>
    %95 = vector.broadcast %94 : vector<16x1xi1> to vector<16x32xi1>
    %96 = arith.select %95, %93, %88 : vector<16x32xi1>, vector<16x32xbf16>
    %c0_40 = arith.constant 0 : index
    %c1_41 = arith.constant 1 : index
    %c0_42 = arith.constant 0 : index
    %c0_43 = arith.constant 0 : index
    %97 = vector.load %arg8[%c0_40, %c1_41, %c0_42, %c0_43] : memref<3x3x32x32xbf16, #tpu.memory_space<vmem>>, vector<1x1x32x32xbf16>
    %98 = vector.shape_cast %97 : vector<1x1x32x32xbf16> to vector<32x32xbf16>
    %cst_44 = arith.constant dense<0.000000e+00> : vector<16x32xf32>
    %99 = tpu.matmul %83, %98, %cst_44 {dimension_numbers = #tpu.dot_dimension_numbers<[1], [0], [0], [1], [0, 0, 1, 1], [], []>} : vector<16x32xbf16>, vector<32x32xbf16>, vector<16x32xf32> -> vector<16x32xf32>
    %c0_45 = arith.constant 0 : index
    %c0_46 = arith.constant 0 : index
    %c0_47 = arith.constant 0 : index
    %c0_48 = arith.constant 0 : index
    %100 = vector.load %arg8[%c0_45, %c0_46, %c0_47, %c0_48] : memref<3x3x32x32xbf16, #tpu.memory_space<vmem>>, vector<1x1x32x32xbf16>
    %101 = vector.shape_cast %100 : vector<1x1x32x32xbf16> to vector<32x32xbf16>
    %cst_49 = arith.constant dense<0.000000e+00> : vector<16x32xf32>
    %102 = tpu.matmul %92, %101, %cst_49 {dimension_numbers = #tpu.dot_dimension_numbers<[1], [0], [0], [1], [0, 0, 1, 1], [], []>} : vector<16x32xbf16>, vector<32x32xbf16>, vector<16x32xf32> -> vector<16x32xf32>
    %103 = arith.addf %99, %102 : vector<16x32xf32>
    %c0_50 = arith.constant 0 : index
    %c2_51 = arith.constant 2 : index
    %c0_52 = arith.constant 0 : index
    %c0_53 = arith.constant 0 : index
    %104 = vector.load %arg8[%c0_50, %c2_51, %c0_52, %c0_53] : memref<3x3x32x32xbf16, #tpu.memory_space<vmem>>, vector<1x1x32x32xbf16>
    %105 = vector.shape_cast %104 : vector<1x1x32x32xbf16> to vector<32x32xbf16>
    %cst_54 = arith.constant dense<0.000000e+00> : vector<16x32xf32>
    %106 = tpu.matmul %96, %105, %cst_54 {dimension_numbers = #tpu.dot_dimension_numbers<[1], [0], [0], [1], [0, 0, 1, 1], [], []>} : vector<16x32xbf16>, vector<32x32xbf16>, vector<16x32xf32> -> vector<16x32xf32>
    %107 = arith.addf %103, %106 : vector<16x32xf32>
    %c0_55 = arith.constant 0 : index
    %c0_56 = arith.constant 0 : index
    %c0_57 = arith.constant 0 : index
    %108 = vector.load %arg9[%c0_55, %c0_56, %c0_57] : memref<3x1x32xf32, #tpu.memory_space<vmem>>, vector<1x1x32xf32>
    %109 = vector.shape_cast %108 : vector<1x1x32xf32> to vector<1x32xf32>
    %110 = vector.broadcast %109 : vector<1x32xf32> to vector<16x32xf32>
    %111 = arith.addf %107, %110 : vector<16x32xf32>
    %cst_58 = arith.constant 0.000000e+00 : f32
    %112 = vector.broadcast %cst_58 : f32 to vector<16x32xf32>
    %113 = arith.maximumf %111, %112 : vector<16x32xf32>
    %c0_59 = arith.constant 0 : index
    %c0_60 = arith.constant 0 : index
    %c0_61 = arith.constant 0 : index
    %114 = vector.load %arg10[%c0_59, %c0_60, %c0_61] : memref<3x1x32xf32, #tpu.memory_space<vmem>>, vector<1x1x32xf32>
    %115 = vector.shape_cast %114 : vector<1x1x32xf32> to vector<1x32xf32>
    %c0_62 = arith.constant 0 : index
    %c0_63 = arith.constant 0 : index
    %c0_64 = arith.constant 0 : index
    %116 = vector.load %arg11[%c0_62, %c0_63, %c0_64] : memref<3x1x32xf32, #tpu.memory_space<vmem>>, vector<1x1x32xf32>
    %117 = vector.shape_cast %116 : vector<1x1x32xf32> to vector<1x32xf32>
    %cst_65 = arith.constant dense<0.000000e+00> : vector<16xf32>
    %118 = vector.multi_reduction <add>, %113, %cst_65 [1] : vector<16x32xf32> to vector<16xf32>
    %119 = vector.shape_cast %118 : vector<16xf32> to vector<16x1xf32>
    %cst_66 = arith.constant 3.200000e+01 : f32
    %120 = vector.broadcast %cst_66 : f32 to vector<16x1xf32>
    %121 = arith.divf %119, %120 : vector<16x1xf32>
    %122 = vector.broadcast %121 : vector<16x1xf32> to vector<16x32xf32>
    %123 = arith.subf %113, %122 : vector<16x32xf32>
    %124 = arith.mulf %123, %123 : vector<16x32xf32>
    %cst_67 = arith.constant dense<0.000000e+00> : vector<16xf32>
    %125 = vector.multi_reduction <add>, %124, %cst_67 [1] : vector<16x32xf32> to vector<16xf32>
    %126 = vector.shape_cast %125 : vector<16xf32> to vector<16x1xf32>
    %cst_68 = arith.constant 3.200000e+01 : f32
    %127 = vector.broadcast %cst_68 : f32 to vector<16x1xf32>
    %128 = arith.divf %126, %127 : vector<16x1xf32>
    %129 = vector.broadcast %121 : vector<16x1xf32> to vector<16x32xf32>
    %130 = arith.subf %113, %129 : vector<16x32xf32>
    %cst_69 = arith.constant 9.99999974E-6 : f32
    %131 = vector.broadcast %cst_69 : f32 to vector<16x1xf32>
    %132 = arith.addf %128, %131 : vector<16x1xf32>
    %133 = math.rsqrt %132 : vector<16x1xf32>
    %134 = vector.broadcast %133 : vector<16x1xf32> to vector<16x32xf32>
    %135 = arith.mulf %130, %134 : vector<16x32xf32>
    %136 = vector.broadcast %115 : vector<1x32xf32> to vector<16x32xf32>
    %137 = arith.mulf %135, %136 : vector<16x32xf32>
    %138 = vector.broadcast %117 : vector<1x32xf32> to vector<16x32xf32>
    %139 = arith.addf %137, %138 : vector<16x32xf32>
    %c0_70 = arith.constant 0 : index
    %c0_71 = arith.constant 0 : index
    %c0_72 = arith.constant 0 : index
    %140 = vector.load %arg12[%c0_70, %c0_71, %c0_72] : memref<3x1x32xf32, #tpu.memory_space<vmem>>, vector<1x1x32xf32>
    %141 = vector.shape_cast %140 : vector<1x1x32xf32> to vector<1x32xf32>
    %142 = vector.broadcast %141 : vector<1x32xf32> to vector<16x32xf32>
    %143 = arith.mulf %139, %142 : vector<16x32xf32>
    %cst_73 = arith.constant dense<0.000000e+00> : vector<16xf32>
    %144 = vector.multi_reduction <add>, %143, %cst_73 [1] : vector<16x32xf32> to vector<16xf32>
    %145 = vector.shape_cast %144 : vector<16xf32> to vector<16x1xf32>
    %c0_74 = arith.constant 0 : index
    %c0_75 = arith.constant 0 : index
    %c0_76 = arith.constant 0 : index
    %146 = vector.load %arg13[%c0_74, %c0_75, %c0_76] : memref<3x1x1xf32, #tpu.memory_space<vmem>>, vector<1x1x1xf32>
    %147 = vector.shape_cast %146 : vector<1x1x1xf32> to vector<1x1xf32>
    %148 = vector.broadcast %147 : vector<1x1xf32> to vector<16x1xf32>
    %149 = arith.addf %145, %148 : vector<16x1xf32>
    %cst_77 = arith.constant 5.000000e-01 : f32
    %150 = vector.broadcast %cst_77 : f32 to vector<16x1xf32>
    %151 = arith.cmpf ogt, %2, %150 : vector<16x1xf32>
    %cst_78 = arith.constant 0.000000e+00 : f32
    %152 = vector.broadcast %cst_78 : f32 to vector<16x1xf32>
    %153 = arith.select %151, %152, %149 : vector<16x1xi1>, vector<16x1xf32>
    %c0_79 = arith.constant 0 : index
    %c0_80 = arith.constant 0 : index
    %154 = vector.load %arg17[%c0_79, %c0_80] : memref<16x3xf32, #tpu.memory_space<vmem>>, vector<16x1xf32>
    tpu.vector_store %arg17[%c0_79, %c0_80], %153 {strides = array<i32>} : memref<16x3xf32, #tpu.memory_space<vmem>>, vector<16x1xf32>,
    %c1_81 = arith.constant 1 : index
    %c1_82 = arith.constant 1 : index
    %c0_83 = arith.constant 0 : index
    %c0_84 = arith.constant 0 : index
    %155 = vector.load %arg4[%c1_81, %c1_82, %c0_83, %c0_84] : memref<3x3x32x32xbf16, #tpu.memory_space<vmem>>, vector<1x1x32x32xbf16>
    %156 = vector.shape_cast %155 : vector<1x1x32x32xbf16> to vector<32x32xbf16>
    %cst_85 = arith.constant dense<0.000000e+00> : vector<16x32xf32>
    %157 = tpu.matmul %26, %156, %cst_85 {dimension_numbers = #tpu.dot_dimension_numbers<[1], [0], [0], [1], [0, 0, 1, 1], [], []>} : vector<16x32xbf16>, vector<32x32xbf16>, vector<16x32xf32> -> vector<16x32xf32>
    %c1_86 = arith.constant 1 : index
    %c0_87 = arith.constant 0 : index
    %c0_88 = arith.constant 0 : index
    %c0_89 = arith.constant 0 : index
    %158 = vector.load %arg4[%c1_86, %c0_87, %c0_88, %c0_89] : memref<3x3x32x32xbf16, #tpu.memory_space<vmem>>, vector<1x1x32x32xbf16>
    %159 = vector.shape_cast %158 : vector<1x1x32x32xbf16> to vector<32x32xbf16>
    %cst_90 = arith.constant dense<0.000000e+00> : vector<16x32xf32>
    %160 = tpu.matmul %35, %159, %cst_90 {dimension_numbers = #tpu.dot_dimension_numbers<[1], [0], [0], [1], [0, 0, 1, 1], [], []>} : vector<16x32xbf16>, vector<32x32xbf16>, vector<16x32xf32> -> vector<16x32xf32>
    %161 = arith.addf %157, %160 : vector<16x32xf32>
    %c1_91 = arith.constant 1 : index
    %c2_92 = arith.constant 2 : index
    %c0_93 = arith.constant 0 : index
    %c0_94 = arith.constant 0 : index
    %162 = vector.load %arg4[%c1_91, %c2_92, %c0_93, %c0_94] : memref<3x3x32x32xbf16, #tpu.memory_space<vmem>>, vector<1x1x32x32xbf16>
    %163 = vector.shape_cast %162 : vector<1x1x32x32xbf16> to vector<32x32xbf16>
    %cst_95 = arith.constant dense<0.000000e+00> : vector<16x32xf32>
    %164 = tpu.matmul %39, %163, %cst_95 {dimension_numbers = #tpu.dot_dimension_numbers<[1], [0], [0], [1], [0, 0, 1, 1], [], []>} : vector<16x32xbf16>, vector<32x32xbf16>, vector<16x32xf32> -> vector<16x32xf32>
    %165 = arith.addf %161, %164 : vector<16x32xf32>
    %c1_96 = arith.constant 1 : index
    %c0_97 = arith.constant 0 : index
    %c0_98 = arith.constant 0 : index
    %166 = vector.load %arg5[%c1_96, %c0_97, %c0_98] : memref<3x1x32xf32, #tpu.memory_space<vmem>>, vector<1x1x32xf32>
    %167 = vector.shape_cast %166 : vector<1x1x32xf32> to vector<1x32xf32>
    %168 = vector.broadcast %167 : vector<1x32xf32> to vector<16x32xf32>
    %169 = arith.addf %165, %168 : vector<16x32xf32>
    %cst_99 = arith.constant 0.000000e+00 : f32
    %170 = vector.broadcast %cst_99 : f32 to vector<16x32xf32>
    %171 = arith.maximumf %169, %170 : vector<16x32xf32>
    %c1_100 = arith.constant 1 : index
    %c0_101 = arith.constant 0 : index
    %c0_102 = arith.constant 0 : index
    %172 = vector.load %arg6[%c1_100, %c0_101, %c0_102] : memref<3x1x32xf32, #tpu.memory_space<vmem>>, vector<1x1x32xf32>
    %173 = vector.shape_cast %172 : vector<1x1x32xf32> to vector<1x32xf32>
    %c1_103 = arith.constant 1 : index
    %c0_104 = arith.constant 0 : index
    %c0_105 = arith.constant 0 : index
    %174 = vector.load %arg7[%c1_103, %c0_104, %c0_105] : memref<3x1x32xf32, #tpu.memory_space<vmem>>, vector<1x1x32xf32>
    %175 = vector.shape_cast %174 : vector<1x1x32xf32> to vector<1x32xf32>
    %cst_106 = arith.constant dense<0.000000e+00> : vector<16xf32>
    %176 = vector.multi_reduction <add>, %171, %cst_106 [1] : vector<16x32xf32> to vector<16xf32>
    %177 = vector.shape_cast %176 : vector<16xf32> to vector<16x1xf32>
    %cst_107 = arith.constant 3.200000e+01 : f32
    %178 = vector.broadcast %cst_107 : f32 to vector<16x1xf32>
    %179 = arith.divf %177, %178 : vector<16x1xf32>
    %180 = vector.broadcast %179 : vector<16x1xf32> to vector<16x32xf32>
    %181 = arith.subf %171, %180 : vector<16x32xf32>
    %182 = arith.mulf %181, %181 : vector<16x32xf32>
    %cst_108 = arith.constant dense<0.000000e+00> : vector<16xf32>
    %183 = vector.multi_reduction <add>, %182, %cst_108 [1] : vector<16x32xf32> to vector<16xf32>
    %184 = vector.shape_cast %183 : vector<16xf32> to vector<16x1xf32>
    %cst_109 = arith.constant 3.200000e+01 : f32
    %185 = vector.broadcast %cst_109 : f32 to vector<16x1xf32>
    %186 = arith.divf %184, %185 : vector<16x1xf32>
    %187 = vector.broadcast %179 : vector<16x1xf32> to vector<16x32xf32>
    %188 = arith.subf %171, %187 : vector<16x32xf32>
    %cst_110 = arith.constant 9.99999974E-6 : f32
    %189 = vector.broadcast %cst_110 : f32 to vector<16x1xf32>
    %190 = arith.addf %186, %189 : vector<16x1xf32>
    %191 = math.rsqrt %190 : vector<16x1xf32>
    %192 = vector.broadcast %191 : vector<16x1xf32> to vector<16x32xf32>
    %193 = arith.mulf %188, %192 : vector<16x32xf32>
    %194 = vector.broadcast %173 : vector<1x32xf32> to vector<16x32xf32>
    %195 = arith.mulf %193, %194 : vector<16x32xf32>
    %196 = vector.broadcast %175 : vector<1x32xf32> to vector<16x32xf32>
    %197 = arith.addf %195, %196 : vector<16x32xf32>
    %198 = arith.truncf %197 : vector<16x32xf32> to vector<16x32xbf16>
    %cst_111 = arith.constant 0.000000e+00 : bf16
    %199 = vector.broadcast %cst_111 : bf16 to vector<1x32xbf16>
    %200 = vector.extract_strided_slice %198 {offsets = [0, 0], sizes = [15, 32], strides = [1, 1]} : vector<16x32xbf16> to vector<15x32xbf16>
    %201 = tpu.concatenate %199, %200 in 0 : vector<1x32xbf16>, vector<15x32xbf16> -> vector<16x32xbf16>
    %202 = vector.extract_strided_slice %198 {offsets = [1, 0], sizes = [15, 32], strides = [1, 1]} : vector<16x32xbf16> to vector<15x32xbf16>
    %203 = tpu.concatenate %202, %199 in 0 : vector<15x32xbf16>, vector<1x32xbf16> -> vector<16x32xbf16>
    %cst_112 = arith.constant 0.000000e+00 : bf16
    %204 = vector.broadcast %cst_112 : bf16 to vector<16x32xbf16>
    %205 = vector.shape_cast %23 : vector<16x1xi1> to vector<16x1xi1>
    %206 = vector.broadcast %205 : vector<16x1xi1> to vector<16x32xi1>
    %207 = arith.select %206, %204, %201 : vector<16x32xi1>, vector<16x32xbf16>
    %cst_113 = arith.constant 0.000000e+00 : bf16
    %208 = vector.broadcast %cst_113 : bf16 to vector<16x32xbf16>
    %209 = vector.shape_cast %25 : vector<16x1xi1> to vector<16x1xi1>
    %210 = vector.broadcast %209 : vector<16x1xi1> to vector<16x32xi1>
    %211 = arith.select %210, %208, %203 : vector<16x32xi1>, vector<16x32xbf16>
    %c1_114 = arith.constant 1 : index
    %c1_115 = arith.constant 1 : index
    %c0_116 = arith.constant 0 : index
    %c0_117 = arith.constant 0 : index
    %212 = vector.load %arg8[%c1_114, %c1_115, %c0_116, %c0_117] : memref<3x3x32x32xbf16, #tpu.memory_space<vmem>>, vector<1x1x32x32xbf16>
    %213 = vector.shape_cast %212 : vector<1x1x32x32xbf16> to vector<32x32xbf16>
    %cst_118 = arith.constant dense<0.000000e+00> : vector<16x32xf32>
    %214 = tpu.matmul %198, %213, %cst_118 {dimension_numbers = #tpu.dot_dimension_numbers<[1], [0], [0], [1], [0, 0, 1, 1], [], []>} : vector<16x32xbf16>, vector<32x32xbf16>, vector<16x32xf32> -> vector<16x32xf32>
    %c1_119 = arith.constant 1 : index
    %c0_120 = arith.constant 0 : index
    %c0_121 = arith.constant 0 : index
    %c0_122 = arith.constant 0 : index
    %215 = vector.load %arg8[%c1_119, %c0_120, %c0_121, %c0_122] : memref<3x3x32x32xbf16, #tpu.memory_space<vmem>>, vector<1x1x32x32xbf16>
    %216 = vector.shape_cast %215 : vector<1x1x32x32xbf16> to vector<32x32xbf16>
    %cst_123 = arith.constant dense<0.000000e+00> : vector<16x32xf32>
    %217 = tpu.matmul %207, %216, %cst_123 {dimension_numbers = #tpu.dot_dimension_numbers<[1], [0], [0], [1], [0, 0, 1, 1], [], []>} : vector<16x32xbf16>, vector<32x32xbf16>, vector<16x32xf32> -> vector<16x32xf32>
    %218 = arith.addf %214, %217 : vector<16x32xf32>
    %c1_124 = arith.constant 1 : index
    %c2_125 = arith.constant 2 : index
    %c0_126 = arith.constant 0 : index
    %c0_127 = arith.constant 0 : index
    %219 = vector.load %arg8[%c1_124, %c2_125, %c0_126, %c0_127] : memref<3x3x32x32xbf16, #tpu.memory_space<vmem>>, vector<1x1x32x32xbf16>
    %220 = vector.shape_cast %219 : vector<1x1x32x32xbf16> to vector<32x32xbf16>
    %cst_128 = arith.constant dense<0.000000e+00> : vector<16x32xf32>
    %221 = tpu.matmul %211, %220, %cst_128 {dimension_numbers = #tpu.dot_dimension_numbers<[1], [0], [0], [1], [0, 0, 1, 1], [], []>} : vector<16x32xbf16>, vector<32x32xbf16>, vector<16x32xf32> -> vector<16x32xf32>
    %222 = arith.addf %218, %221 : vector<16x32xf32>
    %c1_129 = arith.constant 1 : index
    %c0_130 = arith.constant 0 : index
    %c0_131 = arith.constant 0 : index
    %223 = vector.load %arg9[%c1_129, %c0_130, %c0_131] : memref<3x1x32xf32, #tpu.memory_space<vmem>>, vector<1x1x32xf32>
    %224 = vector.shape_cast %223 : vector<1x1x32xf32> to vector<1x32xf32>
    %225 = vector.broadcast %224 : vector<1x32xf32> to vector<16x32xf32>
    %226 = arith.addf %222, %225 : vector<16x32xf32>
    %cst_132 = arith.constant 0.000000e+00 : f32
    %227 = vector.broadcast %cst_132 : f32 to vector<16x32xf32>
    %228 = arith.maximumf %226, %227 : vector<16x32xf32>
    %c1_133 = arith.constant 1 : index
    %c0_134 = arith.constant 0 : index
    %c0_135 = arith.constant 0 : index
    %229 = vector.load %arg10[%c1_133, %c0_134, %c0_135] : memref<3x1x32xf32, #tpu.memory_space<vmem>>, vector<1x1x32xf32>
    %230 = vector.shape_cast %229 : vector<1x1x32xf32> to vector<1x32xf32>
    %c1_136 = arith.constant 1 : index
    %c0_137 = arith.constant 0 : index
    %c0_138 = arith.constant 0 : index
    %231 = vector.load %arg11[%c1_136, %c0_137, %c0_138] : memref<3x1x32xf32, #tpu.memory_space<vmem>>, vector<1x1x32xf32>
    %232 = vector.shape_cast %231 : vector<1x1x32xf32> to vector<1x32xf32>
    %cst_139 = arith.constant dense<0.000000e+00> : vector<16xf32>
    %233 = vector.multi_reduction <add>, %228, %cst_139 [1] : vector<16x32xf32> to vector<16xf32>
    %234 = vector.shape_cast %233 : vector<16xf32> to vector<16x1xf32>
    %cst_140 = arith.constant 3.200000e+01 : f32
    %235 = vector.broadcast %cst_140 : f32 to vector<16x1xf32>
    %236 = arith.divf %234, %235 : vector<16x1xf32>
    %237 = vector.broadcast %236 : vector<16x1xf32> to vector<16x32xf32>
    %238 = arith.subf %228, %237 : vector<16x32xf32>
    %239 = arith.mulf %238, %238 : vector<16x32xf32>
    %cst_141 = arith.constant dense<0.000000e+00> : vector<16xf32>
    %240 = vector.multi_reduction <add>, %239, %cst_141 [1] : vector<16x32xf32> to vector<16xf32>
    %241 = vector.shape_cast %240 : vector<16xf32> to vector<16x1xf32>
    %cst_142 = arith.constant 3.200000e+01 : f32
    %242 = vector.broadcast %cst_142 : f32 to vector<16x1xf32>
    %243 = arith.divf %241, %242 : vector<16x1xf32>
    %244 = vector.broadcast %236 : vector<16x1xf32> to vector<16x32xf32>
    %245 = arith.subf %228, %244 : vector<16x32xf32>
    %cst_143 = arith.constant 9.99999974E-6 : f32
    %246 = vector.broadcast %cst_143 : f32 to vector<16x1xf32>
    %247 = arith.addf %243, %246 : vector<16x1xf32>
    %248 = math.rsqrt %247 : vector<16x1xf32>
    %249 = vector.broadcast %248 : vector<16x1xf32> to vector<16x32xf32>
    %250 = arith.mulf %245, %249 : vector<16x32xf32>
    %251 = vector.broadcast %230 : vector<1x32xf32> to vector<16x32xf32>
    %252 = arith.mulf %250, %251 : vector<16x32xf32>
    %253 = vector.broadcast %232 : vector<1x32xf32> to vector<16x32xf32>
    %254 = arith.addf %252, %253 : vector<16x32xf32>
    %c1_144 = arith.constant 1 : index
    %c0_145 = arith.constant 0 : index
    %c0_146 = arith.constant 0 : index
    %255 = vector.load %arg12[%c1_144, %c0_145, %c0_146] : memref<3x1x32xf32, #tpu.memory_space<vmem>>, vector<1x1x32xf32>
    %256 = vector.shape_cast %255 : vector<1x1x32xf32> to vector<1x32xf32>
    %257 = vector.broadcast %256 : vector<1x32xf32> to vector<16x32xf32>
    %258 = arith.mulf %254, %257 : vector<16x32xf32>
    %cst_147 = arith.constant dense<0.000000e+00> : vector<16xf32>
    %259 = vector.multi_reduction <add>, %258, %cst_147 [1] : vector<16x32xf32> to vector<16xf32>
    %260 = vector.shape_cast %259 : vector<16xf32> to vector<16x1xf32>
    %c1_148 = arith.constant 1 : index
    %c0_149 = arith.constant 0 : index
    %c0_150 = arith.constant 0 : index
    %261 = vector.load %arg13[%c1_148, %c0_149, %c0_150] : memref<3x1x1xf32, #tpu.memory_space<vmem>>, vector<1x1x1xf32>
    %262 = vector.shape_cast %261 : vector<1x1x1xf32> to vector<1x1xf32>
    %263 = vector.broadcast %262 : vector<1x1xf32> to vector<16x1xf32>
    %264 = arith.addf %260, %263 : vector<16x1xf32>
    %cst_151 = arith.constant 5.000000e-01 : f32
    %265 = vector.broadcast %cst_151 : f32 to vector<16x1xf32>
    %266 = arith.cmpf ogt, %2, %265 : vector<16x1xf32>
    %cst_152 = arith.constant 0.000000e+00 : f32
    %267 = vector.broadcast %cst_152 : f32 to vector<16x1xf32>
    %268 = arith.select %266, %267, %264 : vector<16x1xi1>, vector<16x1xf32>
    %c0_153 = arith.constant 0 : index
    %c1_154 = arith.constant 1 : index
    %269 = vector.load %arg17[%c0_153, %c1_154] : memref<16x3xf32, #tpu.memory_space<vmem>>, vector<16x1xf32>
    tpu.vector_store %arg17[%c0_153, %c1_154], %268 {strides = array<i32>} : memref<16x3xf32, #tpu.memory_space<vmem>>, vector<16x1xf32>,
    %c0_155 = arith.constant 0 : index
    %c0_156 = arith.constant 0 : index
    %c0_157 = arith.constant 0 : index
    %270 = vector.load %arg14[%c0_155, %c0_156, %c0_157] : memref<2x2x128xf32, #tpu.memory_space<vmem>>, vector<1x1x128xf32>
    %271 = vector.shape_cast %270 : vector<1x1x128xf32> to vector<1x128xf32>
    %c0_158 = arith.constant 0 : index
    %c1_159 = arith.constant 1 : index
    %c0_160 = arith.constant 0 : index
    %272 = vector.load %arg14[%c0_158, %c1_159, %c0_160] : memref<2x2x128xf32, #tpu.memory_space<vmem>>, vector<1x1x128xf32>
    %273 = vector.shape_cast %272 : vector<1x1x128xf32> to vector<1x128xf32>
    %274 = vector.broadcast %271 : vector<1x128xf32> to vector<16x128xf32>
    %275 = vector.broadcast %3 : vector<16x1xf32> to vector<16x128xf32>
    %276 = arith.cmpf olt, %274, %275 : vector<16x128xf32>
    %277 = vector.broadcast %3 : vector<16x1xf32> to vector<16x128xf32>
    %278 = vector.broadcast %273 : vector<1x128xf32> to vector<16x128xf32>
    %279 = arith.cmpf ole, %277, %278 : vector<16x128xf32>
    %280 = arith.andi %276, %279 : vector<16x128xi1>
    %281 = arith.extui %280 : vector<16x128xi1> to vector<16x128xi32>
    %282 = arith.sitofp %281 : vector<16x128xi32> to vector<16x128xf32>
    %283 = arith.truncf %282 : vector<16x128xf32> to vector<16x128xbf16>
    %c0_161 = arith.constant 0 : index
    %c0_162 = arith.constant 0 : index
    %c0_163 = arith.constant 0 : index
    %284 = vector.load %arg15[%c0_161, %c0_162, %c0_163] : memref<2x128x32xbf16, #tpu.memory_space<vmem>>, vector<1x128x32xbf16>
    %285 = vector.shape_cast %284 : vector<1x128x32xbf16> to vector<128x32xbf16>
    %cst_164 = arith.constant dense<0.000000e+00> : vector<16x32xf32>
    %286 = tpu.matmul %283, %285, %cst_164 {dimension_numbers = #tpu.dot_dimension_numbers<[1], [0], [0], [1], [0, 0, 1, 1], [], []>} : vector<16x128xbf16>, vector<128x32xbf16>, vector<16x32xf32> -> vector<16x32xf32>
    %287 = arith.addf %0, %286 : vector<16x32xf32>
    %288 = arith.truncf %287 : vector<16x32xf32> to vector<16x32xbf16>
    %cst_165 = arith.constant 0.000000e+00 : bf16
    %289 = vector.broadcast %cst_165 : bf16 to vector<1x32xbf16>
    %290 = vector.extract_strided_slice %288 {offsets = [0, 0], sizes = [15, 32], strides = [1, 1]} : vector<16x32xbf16> to vector<15x32xbf16>
    %291 = tpu.concatenate %289, %290 in 0 : vector<1x32xbf16>, vector<15x32xbf16> -> vector<16x32xbf16>
    %292 = vector.extract_strided_slice %288 {offsets = [1, 0], sizes = [15, 32], strides = [1, 1]} : vector<16x32xbf16> to vector<15x32xbf16>
    %293 = tpu.concatenate %292, %289 in 0 : vector<15x32xbf16>, vector<1x32xbf16> -> vector<16x32xbf16>
    %cst_166 = arith.constant 0.000000e+00 : bf16
    %294 = vector.broadcast %cst_166 : bf16 to vector<16x32xbf16>
    %295 = vector.shape_cast %23 : vector<16x1xi1> to vector<16x1xi1>
    %296 = vector.broadcast %295 : vector<16x1xi1> to vector<16x32xi1>
    %297 = arith.select %296, %294, %291 : vector<16x32xi1>, vector<16x32xbf16>
    %cst_167 = arith.constant 0.000000e+00 : bf16
    %298 = vector.broadcast %cst_167 : bf16 to vector<16x32xbf16>
    %299 = vector.shape_cast %25 : vector<16x1xi1> to vector<16x1xi1>
    %300 = vector.broadcast %299 : vector<16x1xi1> to vector<16x32xi1>
    %301 = arith.select %300, %298, %293 : vector<16x32xi1>, vector<16x32xbf16>
    %c2_168 = arith.constant 2 : index
    %c1_169 = arith.constant 1 : index
    %c0_170 = arith.constant 0 : index
    %c0_171 = arith.constant 0 : index
    %302 = vector.load %arg4[%c2_168, %c1_169, %c0_170, %c0_171] : memref<3x3x32x32xbf16, #tpu.memory_space<vmem>>, vector<1x1x32x32xbf16>
    %303 = vector.shape_cast %302 : vector<1x1x32x32xbf16> to vector<32x32xbf16>
    %cst_172 = arith.constant dense<0.000000e+00> : vector<16x32xf32>
    %304 = tpu.matmul %288, %303, %cst_172 {dimension_numbers = #tpu.dot_dimension_numbers<[1], [0], [0], [1], [0, 0, 1, 1], [], []>} : vector<16x32xbf16>, vector<32x32xbf16>, vector<16x32xf32> -> vector<16x32xf32>
    %c2_173 = arith.constant 2 : index
    %c0_174 = arith.constant 0 : index
    %c0_175 = arith.constant 0 : index
    %c0_176 = arith.constant 0 : index
    %305 = vector.load %arg4[%c2_173, %c0_174, %c0_175, %c0_176] : memref<3x3x32x32xbf16, #tpu.memory_space<vmem>>, vector<1x1x32x32xbf16>
    %306 = vector.shape_cast %305 : vector<1x1x32x32xbf16> to vector<32x32xbf16>
    %cst_177 = arith.constant dense<0.000000e+00> : vector<16x32xf32>
    %307 = tpu.matmul %297, %306, %cst_177 {dimension_numbers = #tpu.dot_dimension_numbers<[1], [0], [0], [1], [0, 0, 1, 1], [], []>} : vector<16x32xbf16>, vector<32x32xbf16>, vector<16x32xf32> -> vector<16x32xf32>
    %308 = arith.addf %304, %307 : vector<16x32xf32>
    %c2_178 = arith.constant 2 : index
    %c2_179 = arith.constant 2 : index
    %c0_180 = arith.constant 0 : index
    %c0_181 = arith.constant 0 : index
    %309 = vector.load %arg4[%c2_178, %c2_179, %c0_180, %c0_181] : memref<3x3x32x32xbf16, #tpu.memory_space<vmem>>, vector<1x1x32x32xbf16>
    %310 = vector.shape_cast %309 : vector<1x1x32x32xbf16> to vector<32x32xbf16>
    %cst_182 = arith.constant dense<0.000000e+00> : vector<16x32xf32>
    %311 = tpu.matmul %301, %310, %cst_182 {dimension_numbers = #tpu.dot_dimension_numbers<[1], [0], [0], [1], [0, 0, 1, 1], [], []>} : vector<16x32xbf16>, vector<32x32xbf16>, vector<16x32xf32> -> vector<16x32xf32>
    %312 = arith.addf %308, %311 : vector<16x32xf32>
    %c2_183 = arith.constant 2 : index
    %c0_184 = arith.constant 0 : index
    %c0_185 = arith.constant 0 : index
    %313 = vector.load %arg5[%c2_183, %c0_184, %c0_185] : memref<3x1x32xf32, #tpu.memory_space<vmem>>, vector<1x1x32xf32>
    %314 = vector.shape_cast %313 : vector<1x1x32xf32> to vector<1x32xf32>
    %315 = vector.broadcast %314 : vector<1x32xf32> to vector<16x32xf32>
    %316 = arith.addf %312, %315 : vector<16x32xf32>
    %cst_186 = arith.constant 0.000000e+00 : f32
    %317 = vector.broadcast %cst_186 : f32 to vector<16x32xf32>
    %318 = arith.maximumf %316, %317 : vector<16x32xf32>
    %c2_187 = arith.constant 2 : index
    %c0_188 = arith.constant 0 : index
    %c0_189 = arith.constant 0 : index
    %319 = vector.load %arg6[%c2_187, %c0_188, %c0_189] : memref<3x1x32xf32, #tpu.memory_space<vmem>>, vector<1x1x32xf32>
    %320 = vector.shape_cast %319 : vector<1x1x32xf32> to vector<1x32xf32>
    %c2_190 = arith.constant 2 : index
    %c0_191 = arith.constant 0 : index
    %c0_192 = arith.constant 0 : index
    %321 = vector.load %arg7[%c2_190, %c0_191, %c0_192] : memref<3x1x32xf32, #tpu.memory_space<vmem>>, vector<1x1x32xf32>
    %322 = vector.shape_cast %321 : vector<1x1x32xf32> to vector<1x32xf32>
    %cst_193 = arith.constant dense<0.000000e+00> : vector<16xf32>
    %323 = vector.multi_reduction <add>, %318, %cst_193 [1] : vector<16x32xf32> to vector<16xf32>
    %324 = vector.shape_cast %323 : vector<16xf32> to vector<16x1xf32>
    %cst_194 = arith.constant 3.200000e+01 : f32
    %325 = vector.broadcast %cst_194 : f32 to vector<16x1xf32>
    %326 = arith.divf %324, %325 : vector<16x1xf32>
    %327 = vector.broadcast %326 : vector<16x1xf32> to vector<16x32xf32>
    %328 = arith.subf %318, %327 : vector<16x32xf32>
    %329 = arith.mulf %328, %328 : vector<16x32xf32>
    %cst_195 = arith.constant dense<0.000000e+00> : vector<16xf32>
    %330 = vector.multi_reduction <add>, %329, %cst_195 [1] : vector<16x32xf32> to vector<16xf32>
    %331 = vector.shape_cast %330 : vector<16xf32> to vector<16x1xf32>
    %cst_196 = arith.constant 3.200000e+01 : f32
    %332 = vector.broadcast %cst_196 : f32 to vector<16x1xf32>
    %333 = arith.divf %331, %332 : vector<16x1xf32>
    %334 = vector.broadcast %326 : vector<16x1xf32> to vector<16x32xf32>
    %335 = arith.subf %318, %334 : vector<16x32xf32>
    %cst_197 = arith.constant 9.99999974E-6 : f32
    %336 = vector.broadcast %cst_197 : f32 to vector<16x1xf32>
    %337 = arith.addf %333, %336 : vector<16x1xf32>
    %338 = math.rsqrt %337 : vector<16x1xf32>
    %339 = vector.broadcast %338 : vector<16x1xf32> to vector<16x32xf32>
    %340 = arith.mulf %335, %339 : vector<16x32xf32>
    %341 = vector.broadcast %320 : vector<1x32xf32> to vector<16x32xf32>
    %342 = arith.mulf %340, %341 : vector<16x32xf32>
    %343 = vector.broadcast %322 : vector<1x32xf32> to vector<16x32xf32>
    %344 = arith.addf %342, %343 : vector<16x32xf32>
    %345 = arith.truncf %344 : vector<16x32xf32> to vector<16x32xbf16>
    %cst_198 = arith.constant 0.000000e+00 : bf16
    %346 = vector.broadcast %cst_198 : bf16 to vector<1x32xbf16>
    %347 = vector.extract_strided_slice %345 {offsets = [0, 0], sizes = [15, 32], strides = [1, 1]} : vector<16x32xbf16> to vector<15x32xbf16>
    %348 = tpu.concatenate %346, %347 in 0 : vector<1x32xbf16>, vector<15x32xbf16> -> vector<16x32xbf16>
    %349 = vector.extract_strided_slice %345 {offsets = [1, 0], sizes = [15, 32], strides = [1, 1]} : vector<16x32xbf16> to vector<15x32xbf16>
    %350 = tpu.concatenate %349, %346 in 0 : vector<15x32xbf16>, vector<1x32xbf16> -> vector<16x32xbf16>
    %cst_199 = arith.constant 0.000000e+00 : bf16
    %351 = vector.broadcast %cst_199 : bf16 to vector<16x32xbf16>
    %352 = vector.shape_cast %23 : vector<16x1xi1> to vector<16x1xi1>
    %353 = vector.broadcast %352 : vector<16x1xi1> to vector<16x32xi1>
    %354 = arith.select %353, %351, %348 : vector<16x32xi1>, vector<16x32xbf16>
    %cst_200 = arith.constant 0.000000e+00 : bf16
    %355 = vector.broadcast %cst_200 : bf16 to vector<16x32xbf16>
    %356 = vector.shape_cast %25 : vector<16x1xi1> to vector<16x1xi1>
    %357 = vector.broadcast %356 : vector<16x1xi1> to vector<16x32xi1>
    %358 = arith.select %357, %355, %350 : vector<16x32xi1>, vector<16x32xbf16>
    %c2_201 = arith.constant 2 : index
    %c1_202 = arith.constant 1 : index
    %c0_203 = arith.constant 0 : index
    %c0_204 = arith.constant 0 : index
    %359 = vector.load %arg8[%c2_201, %c1_202, %c0_203, %c0_204] : memref<3x3x32x32xbf16, #tpu.memory_space<vmem>>, vector<1x1x32x32xbf16>
    %360 = vector.shape_cast %359 : vector<1x1x32x32xbf16> to vector<32x32xbf16>
    %cst_205 = arith.constant dense<0.000000e+00> : vector<16x32xf32>
    %361 = tpu.matmul %345, %360, %cst_205 {dimension_numbers = #tpu.dot_dimension_numbers<[1], [0], [0], [1], [0, 0, 1, 1], [], []>} : vector<16x32xbf16>, vector<32x32xbf16>, vector<16x32xf32> -> vector<16x32xf32>
    %c2_206 = arith.constant 2 : index
    %c0_207 = arith.constant 0 : index
    %c0_208 = arith.constant 0 : index
    %c0_209 = arith.constant 0 : index
    %362 = vector.load %arg8[%c2_206, %c0_207, %c0_208, %c0_209] : memref<3x3x32x32xbf16, #tpu.memory_space<vmem>>, vector<1x1x32x32xbf16>
    %363 = vector.shape_cast %362 : vector<1x1x32x32xbf16> to vector<32x32xbf16>
    %cst_210 = arith.constant dense<0.000000e+00> : vector<16x32xf32>
    %364 = tpu.matmul %354, %363, %cst_210 {dimension_numbers = #tpu.dot_dimension_numbers<[1], [0], [0], [1], [0, 0, 1, 1], [], []>} : vector<16x32xbf16>, vector<32x32xbf16>, vector<16x32xf32> -> vector<16x32xf32>
    %365 = arith.addf %361, %364 : vector<16x32xf32>
    %c2_211 = arith.constant 2 : index
    %c2_212 = arith.constant 2 : index
    %c0_213 = arith.constant 0 : index
    %c0_214 = arith.constant 0 : index
    %366 = vector.load %arg8[%c2_211, %c2_212, %c0_213, %c0_214] : memref<3x3x32x32xbf16, #tpu.memory_space<vmem>>, vector<1x1x32x32xbf16>
    %367 = vector.shape_cast %366 : vector<1x1x32x32xbf16> to vector<32x32xbf16>
    %cst_215 = arith.constant dense<0.000000e+00> : vector<16x32xf32>
    %368 = tpu.matmul %358, %367, %cst_215 {dimension_numbers = #tpu.dot_dimension_numbers<[1], [0], [0], [1], [0, 0, 1, 1], [], []>} : vector<16x32xbf16>, vector<32x32xbf16>, vector<16x32xf32> -> vector<16x32xf32>
    %369 = arith.addf %365, %368 : vector<16x32xf32>
    %c2_216 = arith.constant 2 : index
    %c0_217 = arith.constant 0 : index
    %c0_218 = arith.constant 0 : index
    %370 = vector.load %arg9[%c2_216, %c0_217, %c0_218] : memref<3x1x32xf32, #tpu.memory_space<vmem>>, vector<1x1x32xf32>
    %371 = vector.shape_cast %370 : vector<1x1x32xf32> to vector<1x32xf32>
    %372 = vector.broadcast %371 : vector<1x32xf32> to vector<16x32xf32>
    %373 = arith.addf %369, %372 : vector<16x32xf32>
    %cst_219 = arith.constant 0.000000e+00 : f32
    %374 = vector.broadcast %cst_219 : f32 to vector<16x32xf32>
    %375 = arith.maximumf %373, %374 : vector<16x32xf32>
    %c2_220 = arith.constant 2 : index
    %c0_221 = arith.constant 0 : index
    %c0_222 = arith.constant 0 : index
    %376 = vector.load %arg10[%c2_220, %c0_221, %c0_222] : memref<3x1x32xf32, #tpu.memory_space<vmem>>, vector<1x1x32xf32>
    %377 = vector.shape_cast %376 : vector<1x1x32xf32> to vector<1x32xf32>
    %c2_223 = arith.constant 2 : index
    %c0_224 = arith.constant 0 : index
    %c0_225 = arith.constant 0 : index
    %378 = vector.load %arg11[%c2_223, %c0_224, %c0_225] : memref<3x1x32xf32, #tpu.memory_space<vmem>>, vector<1x1x32xf32>
    %379 = vector.shape_cast %378 : vector<1x1x32xf32> to vector<1x32xf32>
    %cst_226 = arith.constant dense<0.000000e+00> : vector<16xf32>
    %380 = vector.multi_reduction <add>, %375, %cst_226 [1] : vector<16x32xf32> to vector<16xf32>
    %381 = vector.shape_cast %380 : vector<16xf32> to vector<16x1xf32>
    %cst_227 = arith.constant 3.200000e+01 : f32
    %382 = vector.broadcast %cst_227 : f32 to vector<16x1xf32>
    %383 = arith.divf %381, %382 : vector<16x1xf32>
    %384 = vector.broadcast %383 : vector<16x1xf32> to vector<16x32xf32>
    %385 = arith.subf %375, %384 : vector<16x32xf32>
    %386 = arith.mulf %385, %385 : vector<16x32xf32>
    %cst_228 = arith.constant dense<0.000000e+00> : vector<16xf32>
    %387 = vector.multi_reduction <add>, %386, %cst_228 [1] : vector<16x32xf32> to vector<16xf32>
    %388 = vector.shape_cast %387 : vector<16xf32> to vector<16x1xf32>
    %cst_229 = arith.constant 3.200000e+01 : f32
    %389 = vector.broadcast %cst_229 : f32 to vector<16x1xf32>
    %390 = arith.divf %388, %389 : vector<16x1xf32>
    %391 = vector.broadcast %383 : vector<16x1xf32> to vector<16x32xf32>
    %392 = arith.subf %375, %391 : vector<16x32xf32>
    %cst_230 = arith.constant 9.99999974E-6 : f32
    %393 = vector.broadcast %cst_230 : f32 to vector<16x1xf32>
    %394 = arith.addf %390, %393 : vector<16x1xf32>
    %395 = math.rsqrt %394 : vector<16x1xf32>
    %396 = vector.broadcast %395 : vector<16x1xf32> to vector<16x32xf32>
    %397 = arith.mulf %392, %396 : vector<16x32xf32>
    %398 = vector.broadcast %377 : vector<1x32xf32> to vector<16x32xf32>
    %399 = arith.mulf %397, %398 : vector<16x32xf32>
    %400 = vector.broadcast %379 : vector<1x32xf32> to vector<16x32xf32>
    %401 = arith.addf %399, %400 : vector<16x32xf32>
    %c2_231 = arith.constant 2 : index
    %c0_232 = arith.constant 0 : index
    %c0_233 = arith.constant 0 : index
    %402 = vector.load %arg12[%c2_231, %c0_232, %c0_233] : memref<3x1x32xf32, #tpu.memory_space<vmem>>, vector<1x1x32xf32>
    %403 = vector.shape_cast %402 : vector<1x1x32xf32> to vector<1x32xf32>
    %404 = vector.broadcast %403 : vector<1x32xf32> to vector<16x32xf32>
    %405 = arith.mulf %401, %404 : vector<16x32xf32>
    %cst_234 = arith.constant dense<0.000000e+00> : vector<16xf32>
    %406 = vector.multi_reduction <add>, %405, %cst_234 [1] : vector<16x32xf32> to vector<16xf32>
    %407 = vector.shape_cast %406 : vector<16xf32> to vector<16x1xf32>
    %c2_235 = arith.constant 2 : index
    %c0_236 = arith.constant 0 : index
    %c0_237 = arith.constant 0 : index
    %408 = vector.load %arg13[%c2_235, %c0_236, %c0_237] : memref<3x1x1xf32, #tpu.memory_space<vmem>>, vector<1x1x1xf32>
    %409 = vector.shape_cast %408 : vector<1x1x1xf32> to vector<1x1xf32>
    %410 = vector.broadcast %409 : vector<1x1xf32> to vector<16x1xf32>
    %411 = arith.addf %407, %410 : vector<16x1xf32>
    %cst_238 = arith.constant 5.000000e-01 : f32
    %412 = vector.broadcast %cst_238 : f32 to vector<16x1xf32>
    %413 = arith.cmpf ogt, %2, %412 : vector<16x1xf32>
    %cst_239 = arith.constant 0.000000e+00 : f32
    %414 = vector.broadcast %cst_239 : f32 to vector<16x1xf32>
    %415 = arith.select %413, %414, %411 : vector<16x1xi1>, vector<16x1xf32>
    %c0_240 = arith.constant 0 : index
    %c2_241 = arith.constant 2 : index
    %416 = vector.load %arg17[%c0_240, %c2_241] : memref<16x3xf32, #tpu.memory_space<vmem>>, vector<16x1xf32>
    tpu.vector_store %arg17[%c0_240, %c2_241], %415 {strides = array<i32>} : memref<16x3xf32, #tpu.memory_space<vmem>>, vector<16x1xf32>,
    %c1_242 = arith.constant 1 : index
    %c0_243 = arith.constant 0 : index
    %c0_244 = arith.constant 0 : index
    %417 = vector.load %arg14[%c1_242, %c0_243, %c0_244] : memref<2x2x128xf32, #tpu.memory_space<vmem>>, vector<1x1x128xf32>
    %418 = vector.shape_cast %417 : vector<1x1x128xf32> to vector<1x128xf32>
    %c1_245 = arith.constant 1 : index
    %c1_246 = arith.constant 1 : index
    %c0_247 = arith.constant 0 : index
    %419 = vector.load %arg14[%c1_245, %c1_246, %c0_247] : memref<2x2x128xf32, #tpu.memory_space<vmem>>, vector<1x1x128xf32>
    %420 = vector.shape_cast %419 : vector<1x1x128xf32> to vector<1x128xf32>
    %421 = vector.broadcast %418 : vector<1x128xf32> to vector<16x128xf32>
    %422 = vector.broadcast %4 : vector<16x1xf32> to vector<16x128xf32>
    %423 = arith.cmpf olt, %421, %422 : vector<16x128xf32>
    %424 = vector.broadcast %4 : vector<16x1xf32> to vector<16x128xf32>
    %425 = vector.broadcast %420 : vector<1x128xf32> to vector<16x128xf32>
    %426 = arith.cmpf ole, %424, %425 : vector<16x128xf32>
    %427 = arith.andi %423, %426 : vector<16x128xi1>
    %428 = arith.extui %427 : vector<16x128xi1> to vector<16x128xi32>
    %429 = arith.sitofp %428 : vector<16x128xi32> to vector<16x128xf32>
    %430 = arith.truncf %429 : vector<16x128xf32> to vector<16x128xbf16>
    %c1_248 = arith.constant 1 : index
    %c0_249 = arith.constant 0 : index
    %c0_250 = arith.constant 0 : index
    %431 = vector.load %arg15[%c1_248, %c0_249, %c0_250] : memref<2x128x32xbf16, #tpu.memory_space<vmem>>, vector<1x128x32xbf16>
    %432 = vector.shape_cast %431 : vector<1x128x32xbf16> to vector<128x32xbf16>
    %cst_251 = arith.constant dense<0.000000e+00> : vector<16x32xf32>
    %433 = tpu.matmul %430, %432, %cst_251 {dimension_numbers = #tpu.dot_dimension_numbers<[1], [0], [0], [1], [0, 0, 1, 1], [], []>} : vector<16x128xbf16>, vector<128x32xbf16>, vector<16x32xf32> -> vector<16x32xf32>
    %434 = arith.addf %287, %433 : vector<16x32xf32>
    %435 = arith.truncf %434 : vector<16x32xf32> to vector<16x32xbf16>
    %436 = vector.extract_strided_slice %435 {offsets = [0, 0], sizes = [8, 32], strides = [1, 1]} : vector<16x32xbf16> to vector<8x32xbf16>
    %c0_252 = arith.constant 0 : index
    %c0_253 = arith.constant 0 : index
    %c0_254 = arith.constant 0 : index
    %437 = vector.load %arg3[%c0_252, %c0_253, %c0_254] : memref<2x2x8xi32, #tpu.memory_space<vmem>>, vector<1x1x8xi32>
    %438 = vector.shape_cast %437 : vector<1x1x8xi32> to vector<1x8xi32>
    %c0_255 = arith.constant 0 : index
    %c1_256 = arith.constant 1 : index
    %c0_257 = arith.constant 0 : index
    %439 = vector.load %arg3[%c0_255, %c1_256, %c0_257] : memref<2x2x8xi32, #tpu.memory_space<vmem>>, vector<1x1x8xi32>
    %440 = vector.shape_cast %439 : vector<1x1x8xi32> to vector<1x8xi32>
    %441 = tpu.iota {dimensions = array<i32: 0>} : vector<24x8xi32>
    %c0_i32_258 = arith.constant 0 : i32
    %442 = vector.broadcast %c0_i32_258 : i32 to vector<24x8xi32>
    %443 = arith.addi %442, %441 : vector<24x8xi32>
    %444 = vector.broadcast %438 : vector<1x8xi32> to vector<24x8xi32>
    %445 = arith.cmpi sle, %444, %443 : vector<24x8xi32>
    %446 = vector.broadcast %440 : vector<1x8xi32> to vector<24x8xi32>
    %447 = arith.cmpi slt, %443, %446 : vector<24x8xi32>
    %448 = arith.andi %445, %447 : vector<24x8xi1>
    %449 = arith.extui %448 : vector<24x8xi1> to vector<24x8xi32>
    %450 = arith.sitofp %449 : vector<24x8xi32> to vector<24x8xf32>
    %451 = arith.truncf %450 : vector<24x8xf32> to vector<24x8xbf16>
    %cst_259 = arith.constant dense<0.000000e+00> : vector<24x32xf32>
    %452 = tpu.matmul %451, %436, %cst_259 {dimension_numbers = #tpu.dot_dimension_numbers<[1], [0], [0], [1], [0, 0, 1, 1], [], []>} : vector<24x8xbf16>, vector<8x32xbf16>, vector<24x32xf32> -> vector<24x32xf32>
    %c0_260 = arith.constant 0 : index
    %c0_261 = arith.constant 0 : index
    %c0_262 = arith.constant 0 : index
    %453 = vector.load %arg16[%c0_260, %c0_261, %c0_262] : memref<2x24x32xf32, #tpu.memory_space<vmem>>, vector<1x24x32xf32>
    %454 = vector.shape_cast %453 : vector<1x24x32xf32> to vector<24x32xf32>
    %455 = vector.shape_cast %452 : vector<24x32xf32> to vector<1x24x32xf32>
    tpu.vector_store %arg16[%c0_260, %c0_261, %c0_262], %455 {strides = array<i32>} : memref<2x24x32xf32, #tpu.memory_space<vmem>>, vector<1x24x32xf32>,
    %456 = vector.extract_strided_slice %435 {offsets = [8, 0], sizes = [8, 32], strides = [1, 1]} : vector<16x32xbf16> to vector<8x32xbf16>
    %c1_263 = arith.constant 1 : index
    %c0_264 = arith.constant 0 : index
    %c0_265 = arith.constant 0 : index
    %457 = vector.load %arg3[%c1_263, %c0_264, %c0_265] : memref<2x2x8xi32, #tpu.memory_space<vmem>>, vector<1x1x8xi32>
    %458 = vector.shape_cast %457 : vector<1x1x8xi32> to vector<1x8xi32>
    %c1_266 = arith.constant 1 : index
    %c1_267 = arith.constant 1 : index
    %c0_268 = arith.constant 0 : index
    %459 = vector.load %arg3[%c1_266, %c1_267, %c0_268] : memref<2x2x8xi32, #tpu.memory_space<vmem>>, vector<1x1x8xi32>
    %460 = vector.shape_cast %459 : vector<1x1x8xi32> to vector<1x8xi32>
    %461 = tpu.iota {dimensions = array<i32: 0>} : vector<24x8xi32>
    %c0_i32_269 = arith.constant 0 : i32
    %462 = vector.broadcast %c0_i32_269 : i32 to vector<24x8xi32>
    %463 = arith.addi %462, %461 : vector<24x8xi32>
    %464 = vector.broadcast %458 : vector<1x8xi32> to vector<24x8xi32>
    %465 = arith.cmpi sle, %464, %463 : vector<24x8xi32>
    %466 = vector.broadcast %460 : vector<1x8xi32> to vector<24x8xi32>
    %467 = arith.cmpi slt, %463, %466 : vector<24x8xi32>
    %468 = arith.andi %465, %467 : vector<24x8xi1>
    %469 = arith.extui %468 : vector<24x8xi1> to vector<24x8xi32>
    %470 = arith.sitofp %469 : vector<24x8xi32> to vector<24x8xf32>
    %471 = arith.truncf %470 : vector<24x8xf32> to vector<24x8xbf16>
    %cst_270 = arith.constant dense<0.000000e+00> : vector<24x32xf32>
    %472 = tpu.matmul %471, %456, %cst_270 {dimension_numbers = #tpu.dot_dimension_numbers<[1], [0], [0], [1], [0, 0, 1, 1], [], []>} : vector<24x8xbf16>, vector<8x32xbf16>, vector<24x32xf32> -> vector<24x32xf32>
    %c1_271 = arith.constant 1 : index
    %c0_272 = arith.constant 0 : index
    %c0_273 = arith.constant 0 : index
    %473 = vector.load %arg16[%c1_271, %c0_272, %c0_273] : memref<2x24x32xf32, #tpu.memory_space<vmem>>, vector<1x24x32xf32>
    %474 = vector.shape_cast %473 : vector<1x24x32xf32> to vector<24x32xf32>
    %475 = vector.shape_cast %472 : vector<24x32xf32> to vector<1x24x32xf32>
    tpu.vector_store %arg16[%c1_271, %c0_272, %c0_273], %475 {strides = array<i32>} : memref<2x24x32xf32, #tpu.memory_space<vmem>>, vector<1x24x32xf32>,
    return
  }
  func.func @transform_0(%arg0: i32) -> (i32, i32) {
    %c0_i32 = arith.constant 0 : i32
    %c0_i32_0 = arith.constant 0 : i32
    return %arg0, %c0_i32 : i32, i32
  }
  func.func @transform_1(%arg0: i32) -> (i32, i32) {
    %c0_i32 = arith.constant 0 : i32
    %c0_i32_0 = arith.constant 0 : i32
    return %arg0, %c0_i32 : i32, i32
  }
  func.func @transform_2(%arg0: i32) -> (i32, i32, i32) {
    %c0_i32 = arith.constant 0 : i32
    %c0_i32_0 = arith.constant 0 : i32
    %c0_i32_1 = arith.constant 0 : i32
    return %arg0, %c0_i32, %c0_i32_0 : i32, i32, i32
  }
  func.func @transform_3(%arg0: i32) -> (i32, i32, i32, i32) {
    %c0_i32 = arith.constant 0 : i32
    %c0_i32_0 = arith.constant 0 : i32
    %c0_i32_1 = arith.constant 0 : i32
    %c0_i32_2 = arith.constant 0 : i32
    %c0_i32_3 = arith.constant 0 : i32
    return %c0_i32, %c0_i32_0, %c0_i32_1, %c0_i32_2 : i32, i32, i32, i32
  }
  func.func @transform_4(%arg0: i32) -> (i32, i32, i32) {
    %c0_i32 = arith.constant 0 : i32
    %c0_i32_0 = arith.constant 0 : i32
    %c0_i32_1 = arith.constant 0 : i32
    %c0_i32_2 = arith.constant 0 : i32
    return %c0_i32, %c0_i32_0, %c0_i32_1 : i32, i32, i32
  }
  func.func @transform_5(%arg0: i32) -> (i32, i32, i32) {
    %c0_i32 = arith.constant 0 : i32
    %c0_i32_0 = arith.constant 0 : i32
    %c0_i32_1 = arith.constant 0 : i32
    %c0_i32_2 = arith.constant 0 : i32
    return %c0_i32, %c0_i32_0, %c0_i32_1 : i32, i32, i32
  }
  func.func @transform_6(%arg0: i32) -> (i32, i32, i32) {
    %c0_i32 = arith.constant 0 : i32
    %c0_i32_0 = arith.constant 0 : i32
    %c0_i32_1 = arith.constant 0 : i32
    %c0_i32_2 = arith.constant 0 : i32
    return %c0_i32, %c0_i32_0, %c0_i32_1 : i32, i32, i32
  }
  func.func @transform_7(%arg0: i32) -> (i32, i32, i32, i32) {
    %c0_i32 = arith.constant 0 : i32
    %c0_i32_0 = arith.constant 0 : i32
    %c0_i32_1 = arith.constant 0 : i32
    %c0_i32_2 = arith.constant 0 : i32
    %c0_i32_3 = arith.constant 0 : i32
    return %c0_i32, %c0_i32_0, %c0_i32_1, %c0_i32_2 : i32, i32, i32, i32
  }
  func.func @transform_8(%arg0: i32) -> (i32, i32, i32) {
    %c0_i32 = arith.constant 0 : i32
    %c0_i32_0 = arith.constant 0 : i32
    %c0_i32_1 = arith.constant 0 : i32
    %c0_i32_2 = arith.constant 0 : i32
    return %c0_i32, %c0_i32_0, %c0_i32_1 : i32, i32, i32
  }
  func.func @transform_9(%arg0: i32) -> (i32, i32, i32) {
    %c0_i32 = arith.constant 0 : i32
    %c0_i32_0 = arith.constant 0 : i32
    %c0_i32_1 = arith.constant 0 : i32
    %c0_i32_2 = arith.constant 0 : i32
    return %c0_i32, %c0_i32_0, %c0_i32_1 : i32, i32, i32
  }
  func.func @transform_10(%arg0: i32) -> (i32, i32, i32) {
    %c0_i32 = arith.constant 0 : i32
    %c0_i32_0 = arith.constant 0 : i32
    %c0_i32_1 = arith.constant 0 : i32
    %c0_i32_2 = arith.constant 0 : i32
    return %c0_i32, %c0_i32_0, %c0_i32_1 : i32, i32, i32
  }
  func.func @transform_11(%arg0: i32) -> (i32, i32, i32) {
    %c0_i32 = arith.constant 0 : i32
    %c0_i32_0 = arith.constant 0 : i32
    %c0_i32_1 = arith.constant 0 : i32
    %c0_i32_2 = arith.constant 0 : i32
    return %c0_i32, %c0_i32_0, %c0_i32_1 : i32, i32, i32
  }
  func.func @transform_12(%arg0: i32) -> (i32, i32, i32) {
    %c0_i32 = arith.constant 0 : i32
    %c0_i32_0 = arith.constant 0 : i32
    %c0_i32_1 = arith.constant 0 : i32
    %c0_i32_2 = arith.constant 0 : i32
    return %c0_i32, %c0_i32_0, %c0_i32_1 : i32, i32, i32
  }
  func.func @transform_13(%arg0: i32) -> (i32, i32, i32) {
    %c0_i32 = arith.constant 0 : i32
    %c0_i32_0 = arith.constant 0 : i32
    %c0_i32_1 = arith.constant 0 : i32
    %c0_i32_2 = arith.constant 0 : i32
    return %c0_i32, %c0_i32_0, %c0_i32_1 : i32, i32, i32
  }
  func.func @transform_14(%arg0: i32) -> (i32, i32, i32) {
    %c0_i32 = arith.constant 0 : i32
    %c0_i32_0 = arith.constant 0 : i32
    %c0_i32_1 = arith.constant 0 : i32
    %c0_i32_2 = arith.constant 0 : i32
    return %c0_i32, %c0_i32_0, %c0_i32_1 : i32, i32, i32
  }
  func.func @transform_15(%arg0: i32) -> (i32, i32, i32) {
    %c0_i32 = arith.constant 0 : i32
    %c0_i32_0 = arith.constant 0 : i32
    %c0_i32_1 = arith.constant 0 : i32
    return %arg0, %c0_i32, %c0_i32_0 : i32, i32, i32
  }
  func.func @transform_16(%arg0: i32) -> (i32, i32) {
    %c0_i32 = arith.constant 0 : i32
    %c0_i32_0 = arith.constant 0 : i32
    return %arg0, %c0_i32 : i32, i32
  }
}

</mosaic_0001>

<bundles_post_ra>
// kernel: tpu_custom_call.1
= control target key start
LH: loop header
LB: loop body
LE: loop exit
PB: predicated region body
PF: predicated region fallthrough
CT: control target
= control target key end

     0   :  { %s3574_s0 = inlined_call_operand.vmem [shape: f32[16,32], index: 0, kind: input, shape index: {}]   ;;  %s3575_s1 = inlined_call_operand.vmem [shape: f32[16,3], index: 1, kind: input, shape index: {}]   ;;  %s3576_s2 = inlined_call_operand.vmem [shape: s32[2,2,8], index: 2, kind: input, shape index: {}]   ;;  %s3577_s3 = inlined_call_operand.vmem [shape: bf16[3,3,32,32], index: 3, kind: input, shape index: {}]   ;;  %s3578_s4 = inlined_call_operand.vmem [shape: f32[3,1,32], index: 4, kind: input, shape index: {}]   ;;  %s3579_s5 = inlined_call_operand.vmem [shape: f32[3,1,32], index: 5, kind: input, shape index: {}]   ;;  %s3580_s6 = inlined_call_operand.vmem [shape: f32[3,1,32], index: 6, kind: input, shape index: {}]   ;;  %s3581_s7 = inlined_call_operand.hbm [shape: bf16[3,3,32,32], index: 7, kind: input, shape index: {}]   ;;  %s3582_s8 = inlined_call_operand.vmem [shape: f32[3,1,32], index: 8, kind: input, shape index: {}]   ;;  %s3583_s9 = inlined_call_operand.vmem [shape: f32[3,1,32], index: 9, kind: input, shape index: {}]   ;;  %s3584_s10 = inlined_call_operand.vmem [shape: f32[3,1,32], index: 10, kind: input, shape index: {}]   ;;  %s3585_s11 = inlined_call_operand.vmem [shape: f32[3,1,32], index: 11, kind: input, shape index: {}]   ;;  %s3586_s12 = inlined_call_operand.vmem [shape: f32[3,1,1], index: 12, kind: input, shape index: {}]   ;;  %s3587_s13 = inlined_call_operand.vmem [shape: f32[2,2,128], index: 13, kind: input, shape index: {}]   ;;  %s3588_s14 = inlined_call_operand.vmem [shape: bf16[2,128,32], index: 14, kind: input, shape index: {}]   ;;  %s3589_s15 = inlined_call_operand.hbm [shape: f32[2,24,32], index: 15, kind: output, shape index: {0}]   ;;  %s3590_s16 = inlined_call_operand.vmem [shape: f32[16,3], index: 16, kind: output, shape index: {1}]  }
   0x1   :  { %3592 = sst [smem:[#allocation8_spill]] %s3574_s0 }
   0x2   :  { %22 = vsyncpa [#allocation3], 0 }
   0x3   :  { %23 = vsyncpa [#allocation4], 0  ;;  %s2849_s21 = smov [#allocation2]   ;;  %s2801_s25 = scalar_lea.hbm %s3581_s7, 2304 }
   0x4   :  { %s43_s22 = sshll.u32 %s2849_s21, 4  ;;  %p2802_p0 = scmp.ne.s32.totalorder %s3581_s7, %s2801_s25  ;;  %s44_s22 = int_to_ptr.vmem [resolvable:$true] %s43_s22 }
   0x5   :  { %p2805_p1 = scmp.lt.u32.totalorder %s2801_s25, %s3581_s7 }
   0x7   :  { %p2807_p2 = pnand %p2805_p1, %p2802_p0 }
   0x9   :  { %2810 = shalt.err (!%p2807_p2)
}
   0xa   :  { %s2811_s30 = scalar_lea.vmem %s44_s22, 2304  ;;  %p2816_p4 = scmp.lt.s32.totalorder %s44_s22, %s44_s22 }
   0xb   :  { %p2812_p3 = scmp.ne.s32.totalorder %s44_s22, %s2811_s30  ;;  %p2817_p5 = scmp.lt.s32.totalorder %s2811_s30, %s2811_s30 }
   0xd   :  { %p2818_p6 = por %p2817_p5, %p2816_p4 }
   0xf   :  { %p2819_p7 = pnand %p2818_p6, %p2812_p3 }
  0x11   :  { %2822 = shalt.err (!%p2819_p7)
}
  0x12   :  { %s2850_s0 = smov 64   ;;  %s2851_s17 = smov 4  }
  0x13   :  { %49 = dma.hbm_to_vmem [thread:$0]  %s3581_s7, 2304, %s44_s22, [#allocation3], %s2850_s0, %s2850_s0, %s2851_s17  }
  0x14   :  { %2845 = dma.done.wait [#allocation3], 2304  }
  0x15   :  { %2846 = vsyncadd [#allocation3], 4294964992  ;;  %v74_v0 = vlaneseq  ;;  %v2852_v1 = vmov 0.0   ;;  %vm2853_vm0 = vmmov 0   ;;  %vm114_vm2 = vcmask 1040384   ;;  %v2725_v7 = vld [vmem:[%s3577_s3] sm:$0xff]  }
  0x16   :  { %2509 = vmatprep.subr.bf16.mxu1 %v2852_v1  ;;  %2513 = vmatprep.mubr.msk.bf16.mxu1 %vm2853_vm0, %v2852_v1  ;;  %vm115_vm3 = vsmask.f32 256  ;;  %v2726_v8 = vld [vmem:[%s3577_s3 + $0x8] sm:$0xff]   ;;  %s3595_s25 = sld [smem:[#allocation8_spill]]  ;;  %vm121_vm6 = vcmask 1047552   ;;  %v2854_v12 = vmov 0  }
  0x17   :  { %2525 = vmatprep.subr.bf16.mxu0 %v2852_v1  ;;  %v2964_v2 = vshrl.u32 %v74_v0, 7  ;;  %2529 = vmatprep.mubr.msk.bf16.mxu0 %vm2853_vm0, %v2852_v1  ;;  %vm122_vm7 = vsmask.f32 7424  ;;  %vm3003_vm9 = vmand %vm114_vm2, %vm115_vm3  ;;  %v2728_v20 = vld [vmem:[%s3577_s3 + $0x20] sm:$0xff]   ;;  %v2730_v24 = vld [vmem:[%s3577_s3 + $0x28] sm:$0xff]   ;;  %vm172_vm14 = vcmask 261120  }
  0x18   :  { %2510 = vmatpush3.bf16.msra.mxu1 %v2725_v7  ;;  %vm3021_vm12 = vmand %vm121_vm6, %vm122_vm7  ;;  %2526 = vmatpush3.bf16.msra.mxu0 %v2728_v20  ;;  %v2727_v26 = vld [vmem:[%s3577_s3 + $0x10] sm:$0xff]   ;;  %v2729_v37 = vld [vmem:[%s3577_s3 + $0x18] sm:$0xff]  }
  0x19   :  { %v2969_v3 = vadd.s32 8, %v2964_v2  ;;  %v81_v4 = vand.u32 7, %v2964_v2  ;;  %2511 = vmatprep.subr.bf16.mxu1 %v2852_v1  ;;  %2527 = vmatprep.subr.bf16.mxu0 %v2852_v1  ;;  %v2260_v51 = vld [vmem:[%s3578_s4] ss:$0 sm:$0xff]  ;;  %v2732_v16 = vld [vmem:[#allocation2 + $0x18] sm:$0xff]   ;;  %v2775_v36 = vld [vmem:[%s3588_s14 + $0x70] sm:$0xff]  }
  0x1a   :  { %v2773_v29 = vld [vmem:[%s3588_s14 + $0x60] sm:$0xff]  }
  0x1b   :  { %v88_v5 = vand.u32 7, %v2969_v3  ;;  %vm2973_vm1 = vcmp.eq.s32.totalorder %v81_v4, 0  ;;  %vm3007_vm10 = vcmp.eq.s32.totalorder %v81_v4, 7  ;;  %v2385_v22 = vld [vmem:[%s3587_s13 + $0x2] ss:$0 sm:$0xff] }
  0x1c   :  { %v2986_v9 = vld [vmem:[%s3595_s25] sm:$0xff]  ;;  %v2991_v10 = vld [vmem:[%s3595_s25 + $0x8] sm:$0xff]  ;;  %vm129_vm5 = vmpackc.low %vm2973_vm1, %vm2973_vm1  ;;  %2512 = vmatpush3.bf16.msra.mxu1 %v2726_v8  ;;  %2528 = vmatpush3.bf16.msra.mxu0 %v2730_v24 }
  0x1d   :  { %vm102_vm4 = vcmp.eq.s32.totalorder %v88_v5, 0  ;;  %v2999_v11 = vpack.c.bf16 %v2991_v10, %v2986_v9  ;;  %v131_v13 = vsel %vm129_vm5, 65537, %v2854_v12  ;;  %vm3016_vm11 = vcmp.eq.s32.totalorder %v88_v5, 7  ;;  %2517 = vmatprep.subr.bf16.mxu1 %v2852_v1  ;;  %vm142_vm13 = vmpackc.low %vm3007_vm10, %vm3007_vm10  ;;  %2541 = vmatprep.subr.bf16.mxu0 %v2852_v1 }
  0x1e   :  { %vm130_vm8 = vmpackc.low %vm102_vm4, %vm102_vm4  ;;  %v144_v27 = vsel %vm142_vm13, 65537, %v2854_v12 }
  0x1f   :  { %v132_v15 = vsel %vm130_vm8, 65537, %v2854_v12  ;;  %v107_v17 = vshrl.u32 %v2999_v11, 16  ;;  %v110_v18 = vshll.u32 %v2999_v11, 16  ;;  %vm143_vm15 = vmpackc.low %vm3016_vm11, %vm3016_vm11 }
  0x20   :  { %v2241_v19 = vcombine.low %v131_v13, %v132_v15  ;;  %v145_v31 = vsel %vm143_vm15, 65537, %v2854_v12  ;;  %v2731_v15 = vld [vmem:[#allocation2 + $0x10] sm:$0xff]  }
  0x21   :  { %v109_v23 = vrot.slane %v107_v17, 7  ;;  %v118_v25 = vrot.slane %v110_v18, 1  ;;  %v2242_v32 = vcombine.low %v144_v27, %v145_v31 }
  0x22   :  { %vm3039_vm1 = vcmp.ne.s16.totalorder %v2241_v19, 0 }
  0x23   :  { %v112_v28 = vor.u32 %v110_v18, %v109_v23  ;;  %v119_v30 = vor.u32 %v118_v25, %v107_v17  ;;  %vm3051_vm2 = vcmp.ne.s16.totalorder %v2242_v32, 0  ;;  %v2733_v17 = vld [vmem:[#allocation2] sm:$0xff]   ;;  %v2734_v18 = vld [vmem:[#allocation2 + $0x8] sm:$0xff]  }
  0x25   :  { %v117_v33 = vsel %vm3003_vm9, 0, %v112_v28  ;;  %v124_v34 = vsel %vm3021_vm12, %v119_v30, 0  ;;  %v2261_v28 = vld [vmem:[%s3579_s5] ss:$0 sm:$0xff] }
  0x26   :  { %v3049_v35 = vsel %vm3039_vm1, 0, %v117_v33  ;;  %v3063_v38 = vsel %vm3051_vm2, 0, %v124_v34  ;;  %v2262_v33 = vld [vmem:[%s3580_s6] ss:$0 sm:$0xff] }
  0x27   :  { %2514 = vmatmul.mubr.msk.bf16.vlgmr.msra.gmra.mrb[0].mxu1 %vm172_vm14, %v3049_v35  ;;  %2530 = vmatmul.mubr.msk.bf16.vlgmr.msra.gmra.mrb[0].mxu0 %vm172_vm14, %v3063_v38 }
  0x28   :  { %2518 = vmatpush3.bf16.msra.mxu1 %v2727_v26  ;;  %2521 = vmatprep.mubr.msk.bf16.mxu1 %vm2853_vm0, %v2852_v1 }
  0x29   :  { %2519 = vmatprep.subr.bf16.mxu1 %v2852_v1  ;;  %2545 = vmatprep.mubr.msk.bf16.mxu0 %vm2853_vm0, %v2852_v1 }
  0x2a   :  { %2542 = vmatpush3.bf16.msra.mxu0 %v2731_v15 }
  0x2b   :  { %2543 = vmatprep.subr.bf16.mxu0 %v2852_v1 }
  0x2c   :  { %2520 = vmatpush3.bf16.msra.mxu1 %v2729_v37 }
  0x2d   :  { %2533 = vmatprep.subr.bf16.mxu1 %v2852_v1 }
  0x2e   :  { %2544 = vmatpush3.bf16.msra.mxu0 %v2732_v16 }
  0x2f   :  { %2522 = vmatmul.mubr.msk.bf16.vlgmr.msra.gmra.mrb[4].mxu1 %vm172_vm14, %v2999_v11  ;;  %2557 = vmatprep.subr.bf16.mxu0 %v2852_v1 }
  0x30   :  { %2537 = vmatprep.mubr.msk.bf16.mxu1 %vm2853_vm0, %v2852_v1  ;;  %2534 = vmatpush3.bf16.msra.mxu1 %v2733_v17 }
  0x31   :  { %2535 = vmatprep.subr.bf16.mxu1 %v2852_v1 }
  0x34   :  { %2536 = vmatpush3.bf16.msra.mxu1 %v2734_v18 }
  0x35   :  { %2549 = vmatprep.subr.bf16.mxu1 %v2852_v1 }
  0xfa   :  { %v210_v39 = vpop.f32.mrb[0].mxu1  ;;  %v326_v42 = vpop.f32.mrb[0].mxu0 }
  0xfb   :  { %v2515_v40 = vpop.f32.mrb[1].mxu1  ;;  %v2531_v44 = vpop.f32.mrb[1].mxu0 }
  0xfc   :  { %v213_v41 = vpop.f32.mrb[2].mxu1  ;;  %v329_v45 = vpop.f32.mrb[2].mxu0  ;;  %v2736_v40 = vld [vmem:[%s3577_s3 + $0x30] sm:$0xff]   ;;  %v2738_v44 = vld [vmem:[%s3577_s3 + $0x38] sm:$0xff]  }
  0xfd   :  { %v2516_v43 = vpop.f32.mrb[3].mxu1  ;;  %v2532_v46 = vpop.f32.mrb[3].mxu0 }
 0x102   :  { %v265_v47 = vpop.f32.mrb[4].mxu1 }
 0x103   :  { %v266_v48 = vadd.f32 %v265_v47, %v210_v39  ;;  %v2523_v49 = vpop.f32.mrb[5].mxu1 }
 0x104   :  { %v268_v50 = vpop.f32.mrb[6].mxu1 }
 0x105   :  { %v333_v52 = vadd.f32 %v326_v42, %v266_v48  ;;  %v269_v53 = vadd.f32 %v268_v50, %v213_v41  ;;  %v2524_v54 = vpop.f32.mrb[7].mxu1  ;;  %v2735_v48 = vld [vmem:[#allocation2 + $0x20] sm:$0xff]   ;;  %v2740_v50 = vld [vmem:[%s3577_s3 + $0x50] sm:$0xff]  }
 0x106   :  { %v2742_v54 = vld [vmem:[%s3577_s3 + $0x58] sm:$0xff]  }
 0x107   :  { %v334_v55 = vadd.f32 %v329_v45, %v269_v53  ;;  %v342_v56 = vadd.f32 %v2260_v51, %v333_v52  ;;  %v2737_v53 = vld [vmem:[#allocation2 + $0x28] sm:$0xff]  }
 0x109   :  { %v344_v57 = vmax.f32 %v342_v56, 0.0  ;;  %v343_v58 = vadd.f32 %v2260_v51, %v334_v55  ;;  %v2739_v55 = vld [vmem:[%s3577_s3 + $0x40] sm:$0xff]  }
 0x10b   :  { %v348_v59 = vsel %vm172_vm14, %v344_v57, 0.0  ;;  %v345_v60 = vmax.f32 %v343_v58, 0.0 }
 0x10c   :  { %349 = vadd.xlane.f32.xlu0 %v348_v59 }
 0x10d   :  { %v351_v61 = vsel %vm172_vm14, %v345_v60, 0.0 }
 0x110   :  { %352 = vadd.xlane.f32.xlu0 %v351_v61 }
 0x199   :  { %v350_v62 = vpop.xlane.xlu0 %349 }
 0x19a   :  { %v355_v63 = vmul.f32 0.03125, %v350_v62 }
 0x19c   :  { %v357_v0 = vsub.f32 %v344_v57, %v355_v63  ;;  %v2741_v57 = vld [vmem:[%s3577_s3 + $0x48] sm:$0xff]  }
 0x19d   :  { %v353_v4 = vpop.xlane.xlu0 %352 }
 0x19e   :  { %v356_v5 = vmul.f32 0.03125, %v353_v4  ;;  %v359_v6 = vmul.f32 %v357_v0, %v357_v0 }
 0x1a0   :  { %v358_v7 = vsub.f32 %v345_v60, %v356_v5  ;;  %v361_v8 = vsel %vm172_vm14, %v359_v6, 0.0 }
 0x1a1   :  { %362 = vadd.xlane.f32.xlu1 %v361_v8 }
 0x1a2   :  { %v360_v12 = vmul.f32 %v358_v7, %v358_v7 }
 0x1a4   :  { %v364_v13 = vsel %vm172_vm14, %v360_v12, 0.0 }
 0x1a5   :  { %365 = vadd.xlane.f32.xlu1 %v364_v13 }
 0x22e   :  { %v363_v19 = vpop.xlane.xlu1 %362 }
 0x22f   :  { %v367_v20 = vmul.f32 0.03125, %v363_v19 }
 0x231   :  { %v369_v21 = vadd.f32 1e-05, %v367_v20 }
 0x232   :  { %v366_v23 = vpop.xlane.xlu1 %365 }
 0x233   :  { %2777 = vrsqrt.f32 %v369_v21  ;;  %v368_v24 = vmul.f32 0.03125, %v366_v23 }
 0x235   :  { %v370_v25 = vadd.f32 1e-05, %v368_v24 }
 0x237   :  { %2779 = vrsqrt.f32 %v370_v25 }
 0x23d   :  { %v2778_v26 = vpop.eup %2777 }
 0x23e   :  { %v373_v27 = vmul.f32 %v2778_v26, %v357_v0 }
 0x240   :  { %v381_v31 = vmul.f32 %v2261_v28, %v373_v27 }
 0x241   :  { %v2780_v30 = vpop.eup %2779 }
 0x242   :  { %v374_v32 = vmul.f32 %v2780_v30, %v358_v7  ;;  %v389_v37 = vadd.f32 %v2262_v33, %v381_v31 }
 0x244   :  { %v382_v34 = vmul.f32 %v2261_v28, %v374_v32  ;;  %v2299_v28 = vld [vmem:[%s3578_s4 + $0x1] ss:$0 sm:$0xff] }
 0x246   :  { %v390_v39 = vadd.f32 %v2262_v33, %v382_v34 }
 0x248   :  { %v391_v41 = vpack.c.bf16 %v390_v39, %v389_v37 }
 0x24a   :  { %2546 = vmatmul.mubr.msk.bf16.vlgmr.msra.gmra.mrb[4].mxu0 %vm172_vm14, %v391_v41  ;;  %v393_v42 = vshrl.u32 %v391_v41, 16  ;;  %v396_v43 = vshll.u32 %v391_v41, 16 }
 0x24b   :  { %2558 = vmatpush3.bf16.msra.mxu0 %v2736_v40  ;;  %2561 = vmatprep.mubr.msk.bf16.mxu0 %vm2853_vm0, %v2852_v1 }
 0x24c   :  { %v395_v45 = vrot.slane %v393_v42, 7  ;;  %2559 = vmatprep.subr.bf16.mxu0 %v2852_v1  ;;  %v401_v47 = vrot.slane %v396_v43, 1 }
 0x24e   :  { %v398_v46 = vor.u32 %v396_v43, %v395_v45  ;;  %v402_v52 = vor.u32 %v401_v47, %v393_v42  ;;  %v2855_v43 = vmov 1  }
 0x24f   :  { %2560 = vmatpush3.bf16.msra.mxu0 %v2738_v44  ;;  %2722 = vset.pattern.permute.xlu1 %v2855_v43 }
 0x250   :  { %v400_v49 = vsel %vm3003_vm9, 0, %v398_v46  ;;  %2573 = vmatprep.subr.bf16.mxu0 %v2852_v1  ;;  %2721 = vset.pattern.permute.xlu0 %v2855_v43  ;;  %v2324_v43 = vld [vmem:[%s3587_s13 + $0x1] ss:$0 sm:$0xff] }
 0x251   :  { %v405_v51 = vsel %vm3039_vm1, 0, %v400_v49 }
 0x252   :  { %2538 = vmatmul.mubr.msk.bf16.vlgmr.msra.gmra.mrb[8].mxu1 %vm172_vm14, %v405_v51  ;;  %2562 = vmatmul.mubr.msk.bf16.vlgmr.msra.gmra.mrb[8].mxu0 %vm172_vm14, %v3049_v35  ;;  %v404_v35 = vsel %vm3021_vm12, %v402_v52, 0 }
 0x253   :  { %2550 = vmatpush3.bf16.msra.mxu1 %v2735_v48  ;;  %2553 = vmatprep.mubr.msk.bf16.mxu1 %vm2853_vm0, %v2852_v1  ;;  %v406_v56 = vsel %vm3051_vm2, 0, %v404_v35  ;;  %v3168_v35 = vld [vmem:[%s3575_s1] sm:$0xff] }
 0x254   :  { %2551 = vmatprep.subr.bf16.mxu1 %v2852_v1  ;;  %2574 = vmatpush3.bf16.msra.mxu0 %v2740_v50 }
 0x255   :  { %2575 = vmatprep.subr.bf16.mxu0 %v2852_v1  ;;  %2577 = vmatprep.mubr.msk.bf16.mxu0 %vm2853_vm0, %v2852_v1 }
 0x257   :  { %2552 = vmatpush3.bf16.msra.mxu1 %v2737_v53 }
 0x258   :  { %2565 = vmatprep.subr.bf16.mxu1 %v2852_v1  ;;  %2576 = vmatpush3.bf16.msra.mxu0 %v2742_v54  ;;  %v3163_v54 = vld [vmem:[%s3575_s1 + $0x8] sm:$0xff] }
 0x259   :  { %2589 = vmatprep.subr.bf16.mxu0 %v2852_v1 }
 0x25a   :  { %2554 = vmatmul.mubr.msk.bf16.vlgmr.msra.gmra.mrb[12].mxu1 %vm172_vm14, %v406_v56  ;;  %v2744_v56 = vld [vmem:[#allocation2 + $0x48] sm:$0xff]  }
 0x25b   :  { %2566 = vmatpush3.bf16.msra.mxu1 %v2739_v55  ;;  %2569 = vmatprep.mubr.msk.bf16.mxu1 %vm2853_vm0, %v2852_v1  ;;  %v2743_v55 = vld [vmem:[#allocation2 + $0x40] sm:$0xff]  }
 0x25c   :  { %2567 = vmatprep.subr.bf16.mxu1 %v2852_v1  ;;  %2578 = vmatmul.mubr.msk.bf16.vlgmr.msra.gmra.mrb[12].mxu0 %vm172_vm14, %v3063_v38 }
 0x25d   :  { %2593 = vmatprep.mubr.msk.bf16.mxu0 %vm2853_vm0, %v2852_v1  ;;  %2590 = vmatpush3.bf16.msra.mxu0 %v2743_v55 }
 0x25e   :  { %2591 = vmatprep.subr.bf16.mxu0 %v2852_v1 }
 0x25f   :  { %2568 = vmatpush3.bf16.msra.mxu1 %v2741_v57  ;;  %v2746_v57 = vld [vmem:[#allocation2 + $0x30] sm:$0xff]  }
 0x260   :  { %2581 = vmatprep.subr.bf16.mxu1 %v2852_v1 }
 0x261   :  { %2592 = vmatpush3.bf16.msra.mxu0 %v2744_v56 }
 0x262   :  { %2570 = vmatmul.mubr.msk.bf16.vlgmr.msra.gmra.mrb[16].mxu1 %vm172_vm14, %v2999_v11  ;;  %2605 = vmatprep.subr.bf16.mxu0 %v2852_v1 }
 0x263   :  { %2585 = vmatprep.mubr.msk.bf16.mxu1 %vm2853_vm0, %v2852_v1  ;;  %2582 = vmatpush3.bf16.msra.mxu1 %v2746_v57 }
 0x264   :  { %2583 = vmatprep.subr.bf16.mxu1 %v2852_v1 }
 0x31d   :  { %v520_v58 = vpop.f32.mrb[4].mxu0 }
 0x31e   :  { %v2547_v59 = vpop.f32.mrb[5].mxu0 }
 0x31f   :  { %v523_v60 = vpop.f32.mrb[6].mxu0 }
 0x320   :  { %v2548_v61 = vpop.f32.mrb[7].mxu0 }
 0x325   :  { %v465_v62 = vpop.f32.mrb[8].mxu1  ;;  %v732_v63 = vpop.f32.mrb[8].mxu0 }
 0x326   :  { %v521_v0 = vadd.f32 %v520_v58, %v465_v62  ;;  %v2539_v38 = vpop.f32.mrb[9].mxu1  ;;  %v2563_v4 = vpop.f32.mrb[9].mxu0  ;;  %v2748_v58 = vld [vmem:[#allocation2 + $0x38] sm:$0xff]  }
 0x327   :  { %v468_v5 = vpop.f32.mrb[10].mxu1  ;;  %v735_v6 = vpop.f32.mrb[10].mxu0  ;;  %2584 = vmatpush3.bf16.msra.mxu1 %v2748_v58  ;;  %v2302_v4 = vld [vmem:[%s3579_s5 + $0x1] ss:$0 sm:$0xff] }
 0x328   :  { %v524_v7 = vadd.f32 %v523_v60, %v468_v5  ;;  %v2540_v8 = vpop.f32.mrb[11].mxu1  ;;  %v2564_v12 = vpop.f32.mrb[11].mxu0  ;;  %2597 = vmatprep.subr.bf16.mxu1 %v2852_v1 }
 0x329   :  { %v2303_v12 = vld [vmem:[%s3580_s6 + $0x1] ss:$0 sm:$0xff] }
 0x32d   :  { %v581_v13 = vpop.f32.mrb[12].mxu1 }
 0x32e   :  { %v3149_v15 = vadd.f32 %v581_v13, %v521_v0  ;;  %v2555_v11 = vpop.f32.mrb[13].mxu1 }
 0x32f   :  { %v584_v16 = vpop.f32.mrb[14].mxu1  ;;  %v843_v17 = vpop.f32.mrb[12].mxu0 }
 0x330   :  { %v3151_v18 = vadd.f32 %v584_v16, %v524_v7  ;;  %v2556_v19 = vpop.f32.mrb[15].mxu1  ;;  %v2579_v20 = vpop.f32.mrb[13].mxu0 }
 0x331   :  { %v846_v21 = vpop.f32.mrb[14].mxu0 }
 0x332   :  { %v2580_v23 = vpop.f32.mrb[15].mxu0 }
 0x333   :  { %v2747_v23 = vld [vmem:[%s3588_s14 + $0x8] sm:$0xff]  }
 0x335   :  { %v785_v24 = vpop.f32.mrb[16].mxu1 }
 0x336   :  { %v786_v25 = vadd.f32 %v785_v24, %v732_v63  ;;  %v2571_v26 = vpop.f32.mrb[17].mxu1 }
 0x337   :  { %v788_v27 = vpop.f32.mrb[18].mxu1 }
 0x338   :  { %v850_v30 = vadd.f32 %v843_v17, %v786_v25  ;;  %v789_v31 = vadd.f32 %v788_v27, %v735_v6  ;;  %v2572_v32 = vpop.f32.mrb[19].mxu1  ;;  %v2745_v17 = vld [vmem:[%s3588_s14] sm:$0xff]   ;;  %v2749_v27 = vld [vmem:[%s3588_s14 + $0x10] sm:$0xff]  }
 0x33a   :  { %v851_v33 = vadd.f32 %v846_v21, %v789_v31  ;;  %v860_v34 = vadd.f32 %v2299_v28, %v850_v30 }
 0x33c   :  { %v862_v37 = vmax.f32 %v860_v34, 0.0  ;;  %v861_v39 = vadd.f32 %v2299_v28, %v851_v33  ;;  %v2750_v28 = vld [vmem:[#allocation2 + $0x50] sm:$0xff]   ;;  %v2751_v33 = vld [vmem:[%s3588_s14 + $0x18] sm:$0xff]  }
 0x33d   :  { %v2752_v34 = vld [vmem:[#allocation2 + $0x58] sm:$0xff]  }
 0x33e   :  { %v868_v40 = vsel %vm172_vm14, %v862_v37, 0.0  ;;  %v863_v41 = vmax.f32 %v861_v39, 0.0  ;;  %v2753_v39 = vld [vmem:[%s3588_s14 + $0x20] sm:$0xff]  }
 0x33f   :  { %869 = vadd.xlane.f32.xlu0 %v868_v40 }
 0x340   :  { %v871_v42 = vsel %vm172_vm14, %v863_v41, 0.0 }
 0x341   :  { %872 = vadd.xlane.f32.xlu1 %v871_v42  ;;  %v2323_v42 = vld [vmem:[%s3587_s13] ss:$0 sm:$0xff] }
 0x3cc   :  { %v870_v44 = vpop.xlane.xlu0 %869 }
 0x3cd   :  { %v874_v45 = vmul.f32 0.03125, %v870_v44 }
 0x3ce   :  { %v873_v46 = vpop.xlane.xlu1 %872 }
 0x3cf   :  { %v876_v47 = vsub.f32 %v862_v37, %v874_v45  ;;  %v875_v48 = vmul.f32 0.03125, %v873_v46  ;;  %v2755_v46 = vld [vmem:[%s3588_s14 + $0x30] sm:$0xff]  }
 0x3d1   :  { %v877_v49 = vsub.f32 %v863_v41, %v875_v48  ;;  %v878_v50 = vmul.f32 %v876_v47, %v876_v47  ;;  %v2754_v41 = vld [vmem:[%s3588_s14 + $0x28] sm:$0xff]   ;;  %v2856_v48 = vmov 1.0|1.0  }
 0x3d3   :  { %v880_v51 = vsel %vm172_vm14, %v878_v50, 0.0  ;;  %v879_v52 = vmul.f32 %v877_v49, %v877_v49  ;;  %v2758_v50 = vld [vmem:[%s3577_s3 + $0x68] sm:$0xff]  }
 0x3d4   :  { %881 = vadd.xlane.f32.xlu0 %v880_v51 }
 0x3d5   :  { %v883_v53 = vsel %vm172_vm14, %v879_v52, 0.0 }
 0x3d6   :  { %884 = vadd.xlane.f32.xlu1 %v883_v53 }
 0x3e7   :  { %1220 = vperm.xlu1 %2722, %v3163_v54  }
 0x3ea   :  { %1215 = vperm.xlu0 %2721, %v3168_v35  }
 0x461   :  { %v882_v59 = vpop.xlane.xlu0 %881 }
 0x462   :  { %v886_v60 = vmul.f32 0.03125, %v882_v59 }
 0x463   :  { %v885_v61 = vpop.xlane.xlu1 %884 }
 0x464   :  { %v888_v62 = vadd.f32 1e-05, %v886_v60  ;;  %v887_v63 = vmul.f32 0.03125, %v885_v61 }
 0x466   :  { %2781 = vrsqrt.f32 %v888_v62  ;;  %v889_v0 = vadd.f32 1e-05, %v887_v63 }
 0x467   :  { %v1221_v44 = vpop.permute.xlu1 %1220 }
 0x468   :  { %2783 = vrsqrt.f32 %v889_v0  ;;  %vm1224_vm3 = vcmp.lt.f32.partialorder %v2323_v42, %v1221_v44  ;;  %vm1230_vm4 = vcmp.le.f32.partialorder %v1221_v44, %v2324_v43 }
 0x469   :  { %v1216_v45 = vpop.permute.xlu0 %1215  ;;  %vm1232_vm7 = vmand %vm1224_vm3, %vm1230_vm4 }
 0x46a   :  { %vm1223_vm5 = vcmp.lt.f32.partialorder %v2323_v42, %v1216_v45  ;;  %vm1229_vm6 = vcmp.le.f32.partialorder %v1216_v45, %v2324_v43 }
 0x46b   :  { %vm1231_vm8 = vmand %vm1223_vm5, %vm1229_vm6 }
 0x46c   :  { %vm2335_vm10 = vmpackc.low %vm1232_vm7, %vm1231_vm8 }
 0x470   :  { %v2782_v38 = vpop.eup %2781 }
 0x471   :  { %v892_v5 = vmul.f32 %v2782_v38, %v876_v47  ;;  %v2756_v47 = vld [vmem:[%s3588_s14 + $0x38] sm:$0xff]  }
 0x472   :  { %v2784_v6 = vpop.eup %2783 }
 0x473   :  { %v900_v7 = vmul.f32 %v2302_v4, %v892_v5  ;;  %v893_v8 = vmul.f32 %v2784_v6, %v877_v49  ;;  %v2757_v49 = vld [vmem:[%s3577_s3 + $0x60] sm:$0xff]  }
 0x475   :  { %v901_v13 = vmul.f32 %v2302_v4, %v893_v8  ;;  %v908_v11 = vadd.f32 %v2303_v12, %v900_v7 }
 0x477   :  { %v909_v16 = vadd.f32 %v2303_v12, %v901_v13 }
 0x479   :  { %v910_v19 = vpack.c.bf16 %v909_v16, %v908_v11 }
 0x47b   :  { %2594 = vmatmul.mubr.msk.bf16.vlgmr.msra.gmra.mrb[16].mxu0 %vm172_vm14, %v910_v19  ;;  %v912_v20 = vshrl.u32 %v910_v19, 16  ;;  %v915_v21 = vshll.u32 %v910_v19, 16 }
 0x47c   :  { %2606 = vmatpush3.bf16.msra.mxu0 %v2745_v17  ;;  %2621 = vmatprep.mubr.msk.bf16.mxu0 %vm2853_vm0, %v2852_v1 }
 0x47d   :  { %2607 = vmatprep.subr.bf16.mxu0 %v2852_v1  ;;  %v914_v24 = vrot.slane %v912_v20, 7  ;;  %v920_v26 = vrot.slane %v915_v21, 1 }
 0x47f   :  { %v917_v25 = vor.u32 %v915_v21, %v914_v24  ;;  %v921_v32 = vor.u32 %v920_v26, %v912_v20  ;;  %v2761_v26 = vld [vmem:[%s3577_s3 + $0x80] sm:$0xff]  }
 0x480   :  { %2608 = vmatpush3.bf16.msra.mxu0 %v2747_v23  ;;  %v2759_v23 = vld [vmem:[%s3577_s3 + $0x70] sm:$0xff]  }
 0x481   :  { %2609 = vmatprep.subr.bf16.mxu0 %v2852_v1  ;;  %v919_v30 = vsel %vm3003_vm9, 0, %v917_v25  ;;  %v923_v37 = vsel %vm3021_vm12, %v921_v32, 0 }
 0x482   :  { %v924_v31 = vsel %vm3039_vm1, 0, %v919_v30  ;;  %v925_v40 = vsel %vm3051_vm2, 0, %v923_v37 }
 0x483   :  { %2586 = vmatmul.mubr.msk.bf16.vlgmr.msra.gmra.mrb[20].mxu1 %vm172_vm14, %v924_v31 }
 0x484   :  { %2610 = vmatpush3.bf16.msra.mxu0 %v2749_v27  ;;  %2598 = vmatpush3.bf16.msra.mxu1 %v2750_v28  ;;  %v2762_v28 = vld [vmem:[%s3577_s3 + $0x88] sm:$0xff]  }
 0x485   :  { %2611 = vmatprep.subr.bf16.mxu0 %v2852_v1  ;;  %2599 = vmatprep.subr.bf16.mxu1 %v2852_v1 }
 0x486   :  { %2601 = vmatprep.mubr.msk.bf16.mxu1 %vm2853_vm0, %v2852_v1 }
 0x488   :  { %2612 = vmatpush3.bf16.msra.mxu0 %v2751_v33  ;;  %2600 = vmatpush3.bf16.msra.mxu1 %v2752_v34 }
 0x489   :  { %2613 = vmatprep.subr.bf16.mxu0 %v2852_v1  ;;  %2625 = vmatprep.subr.bf16.mxu1 %v2852_v1 }
 0x48b   :  { %2602 = vmatmul.mubr.msk.bf16.vlgmr.msra.gmra.mrb[24].mxu1 %vm172_vm14, %v925_v40 }
 0x48c   :  { %2614 = vmatpush3.bf16.msra.mxu0 %v2753_v39  ;;  %2629 = vmatprep.mubr.msk.bf16.mxu1 %vm2853_vm0, %v2852_v1 }
 0x48d   :  { %2615 = vmatprep.subr.bf16.mxu0 %v2852_v1  ;;  %2626 = vmatpush3.bf16.msra.mxu1 %v2757_v49 }
 0x48e   :  { %2627 = vmatprep.subr.bf16.mxu1 %v2852_v1 }
 0x490   :  { %2616 = vmatpush3.bf16.msra.mxu0 %v2754_v41 }
 0x491   :  { %2617 = vmatprep.subr.bf16.mxu0 %v2852_v1  ;;  %2628 = vmatpush3.bf16.msra.mxu1 %v2758_v50 }
 0x492   :  { %2633 = vmatprep.subr.bf16.mxu1 %v2852_v1 }
 0x494   :  { %2618 = vmatpush3.bf16.msra.mxu0 %v2755_v46  ;;  %v2359_v46 = vld [vmem:[%s3578_s4 + $0x2] ss:$0 sm:$0xff] }
 0x495   :  { %2619 = vmatprep.subr.bf16.mxu0 %v2852_v1 }
 0x498   :  { %2620 = vmatpush3.bf16.msra.mxu0 %v2756_v47 }
 0x499   :  { %2657 = vmatprep.subr.bf16.mxu0 %v2852_v1 }
 0x49b   :  { %2622 = vmatmul.mubr.msk.bf16.vlgmr.msra.gmra.mrb[20].mxu0 %vm2335_vm10, %v2856_v48 }
 0x49c   :  { %2661 = vmatprep.mubr.msk.bf16.mxu0 %vm2853_vm0, %v2852_v1 }
 0x54e   :  { %v1040_v51 = vpop.f32.mrb[16].mxu0 }
 0x54f   :  { %v2595_v52 = vpop.f32.mrb[17].mxu0 }
 0x550   :  { %v1043_v53 = vpop.f32.mrb[18].mxu0 }
 0x551   :  { %v2596_v55 = vpop.f32.mrb[19].mxu0 }
 0x556   :  { %v985_v56 = vpop.f32.mrb[20].mxu1 }
 0x557   :  { %v1041_v57 = vadd.f32 %v1040_v51, %v985_v56  ;;  %v2587_v58 = vpop.f32.mrb[21].mxu1 }
 0x558   :  { %v988_v59 = vpop.f32.mrb[22].mxu1 }
 0x559   :  { %v1044_v60 = vadd.f32 %v1043_v53, %v988_v59  ;;  %v2588_v61 = vpop.f32.mrb[23].mxu1 }
 0x55e   :  { %v1101_v62 = vpop.f32.mrb[24].mxu1 }
 0x55f   :  { %v3250_v63 = vadd.f32 %v1101_v62, %v1041_v57  ;;  %v2603_v0 = vpop.f32.mrb[25].mxu1 }
 0x560   :  { %v1104_v38 = vpop.f32.mrb[26].mxu1 }
 0x561   :  { %v3252_v4 = vadd.f32 %v1104_v38, %v1044_v60  ;;  %v2604_v5 = vpop.f32.mrb[27].mxu1  ;;  %v2857_v60 = vmov 2  }
 0x562   :  { %2723 = vset.pattern.permute.xlu1 %v2857_v60  ;;  %2724 = vset.pattern.permute.xlu0 %v2857_v60 }
 0x56e   :  { %v1336_v6 = vpop.f32.mrb[20].mxu0 }
 0x56f   :  { %v2623_v7 = vpop.f32.mrb[21].mxu0  ;;  %v3255_v12 = vadd.f32 %v1336_v6, %v2986_v9 }
 0x570   :  { %v1339_v8 = vpop.f32.mrb[22].mxu0 }
 0x571   :  { %v3258_v13 = vadd.f32 %v1339_v8, %v2991_v10  ;;  %v2624_v11 = vpop.f32.mrb[23].mxu0  ;;  %v2760_v10 = vld [vmem:[%s3577_s3 + $0x78] sm:$0xff]  }
 0x573   :  { %v1345_v16 = vpack.c.bf16 %v3258_v13, %v3255_v12 }
 0x575   :  { %v1347_v17 = vshrl.u32 %v1345_v16, 16  ;;  %v1350_v20 = vshll.u32 %v1345_v16, 16 }
 0x577   :  { %v1349_v19 = vrot.slane %v1347_v17, 7  ;;  %v1355_v25 = vrot.slane %v1350_v20, 1 }
 0x579   :  { %v1352_v21 = vor.u32 %v1350_v20, %v1349_v19  ;;  %v1356_v27 = vor.u32 %v1355_v25, %v1347_v17  ;;  %v2763_v17 = vld [vmem:[#allocation2 + $0x70] sm:$0xff]   ;;  %v2764_v19 = vld [vmem:[#allocation2 + $0x78] sm:$0xff]   ;;  %v2765_v20 = vld [vmem:[#allocation2 + $0x60] sm:$0xff]  }
 0x57a   :  { %2658 = vmatpush3.bf16.msra.mxu0 %v2763_v17  ;;  %v3392_v17 = vadd.s32 16, %v2964_v2 }
 0x57b   :  { %v1354_v24 = vsel %vm3003_vm9, 0, %v1352_v21  ;;  %v1358_v30 = vsel %vm3021_vm12, %v1356_v27, 0  ;;  %2659 = vmatprep.subr.bf16.mxu0 %v2852_v1  ;;  %v2767_v21 = vld [vmem:[#allocation2 + $0x68] sm:$0xff]  }
 0x57c   :  { %v1359_v9 = vsel %vm3039_vm1, 0, %v1354_v24  ;;  %v1360_v31 = vsel %vm3051_vm2, 0, %v1358_v30 }
 0x57d   :  { %2630 = vmatmul.mubr.msk.bf16.vlgmr.msra.gmra.mrb[28].mxu1 %vm172_vm14, %v1359_v9 }
 0x57e   :  { %2634 = vmatpush3.bf16.msra.mxu1 %v2759_v23  ;;  %2637 = vmatprep.mubr.msk.bf16.mxu1 %vm2853_vm0, %v2852_v1  ;;  %v2314_v23 = vld [vmem:[%s3582_s8 + $0x1] ss:$0 sm:$0xff] }
 0x57f   :  { %2635 = vmatprep.subr.bf16.mxu1 %v2852_v1  ;;  %2660 = vmatpush3.bf16.msra.mxu0 %v2764_v19  ;;  %v3312_v24 = vadd.f32 %v2314_v23, %v3250_v63  ;;  %v3315_v9 = vadd.f32 %v2314_v23, %v3252_v4 }
 0x580   :  { %2673 = vmatprep.subr.bf16.mxu0 %v2852_v1 }
 0x582   :  { %2636 = vmatpush3.bf16.msra.mxu1 %v2760_v10  ;;  %v1120_v10 = vmax.f32 %v3312_v24, 0.0 }
 0x583   :  { %2641 = vmatprep.subr.bf16.mxu1 %v2852_v1 }
 0x584   :  { %v1126_v25 = vsel %vm172_vm14, %v1120_v10, 0.0 }
 0x585   :  { %2638 = vmatmul.mubr.msk.bf16.vlgmr.msra.gmra.mrb[32].mxu1 %vm172_vm14, %v1345_v16 }
 0x586   :  { %2642 = vmatpush3.bf16.msra.mxu1 %v2761_v26  ;;  %2645 = vmatprep.mubr.msk.bf16.mxu1 %vm2853_vm0, %v2852_v1  ;;  %v1121_v26 = vmax.f32 %v3315_v9, 0.0 }
 0x587   :  { %2643 = vmatprep.subr.bf16.mxu1 %v2852_v1 }
 0x588   :  { %v1129_v27 = vsel %vm172_vm14, %v1121_v26, 0.0 }
 0x58a   :  { %2644 = vmatpush3.bf16.msra.mxu1 %v2762_v28 }
 0x58b   :  { %2649 = vmatprep.subr.bf16.mxu1 %v2852_v1 }
 0x58d   :  { %2646 = vmatmul.mubr.msk.bf16.vlgmr.msra.gmra.mrb[36].mxu1 %vm172_vm14, %v1360_v31 }
 0x58e   :  { %2653 = vmatprep.mubr.msk.bf16.mxu1 %vm2853_vm0, %v2852_v1  ;;  %2650 = vmatpush3.bf16.msra.mxu1 %v2765_v20 }
 0x58f   :  { %2651 = vmatprep.subr.bf16.mxu1 %v2852_v1 }
 0x592   :  { %2652 = vmatpush3.bf16.msra.mxu1 %v2767_v21 }
 0x593   :  { %2665 = vmatprep.subr.bf16.mxu1 %v2852_v1 }
 0x650   :  { %v1420_v32 = vpop.f32.mrb[28].mxu1 }
 0x651   :  { %v2631_v33 = vpop.f32.mrb[29].mxu1 }
 0x652   :  { %v1423_v34 = vpop.f32.mrb[30].mxu1 }
 0x653   :  { %v2632_v37 = vpop.f32.mrb[31].mxu1 }
 0x654   :  { %v2362_v37 = vld [vmem:[%s3579_s5 + $0x2] ss:$0 sm:$0xff]  ;;  %s2859_s5 = smov [#allocation5]  }
 0x655   :  { %s2225_s21 = sshll.u32 %s2859_s5, 4  ;;  %s2226_s21 = int_to_ptr.vmem [resolvable:$true] %s2225_s21 }
 0x656   :  { %p2828_p9 = scmp.lt.s32.totalorder %s2226_s21, %s2226_s21 }
 0x658   :  { %v1475_v39 = vpop.f32.mrb[32].mxu1 }
 0x659   :  { %v1476_v40 = vadd.f32 %v1475_v39, %v1420_v32  ;;  %v2639_v41 = vpop.f32.mrb[33].mxu1 }
 0x65a   :  { %v1478_v42 = vpop.f32.mrb[34].mxu1 }
 0x65b   :  { %v1479_v43 = vadd.f32 %v1478_v42, %v1423_v34  ;;  %v2640_v44 = vpop.f32.mrb[35].mxu1  ;;  %v2363_v42 = vld [vmem:[%s3580_s6 + $0x2] ss:$0 sm:$0xff]  ;;  %s2823_s6 = scalar_lea.vmem %s2226_s21, 768 }
 0x65c   :  { %p2824_p8 = scmp.ne.s32.totalorder %s2226_s21, %s2823_s6  ;;  %p2829_p10 = scmp.lt.s32.totalorder %s2823_s6, %s2823_s6 }
 0x65e   :  { %p2830_p11 = por %p2829_p10, %p2828_p9 }
 0x660   :  { %v1536_v45 = vpop.f32.mrb[36].mxu1  ;;  %p2831_p12 = pnand %p2830_p11, %p2824_p8 }
 0x661   :  { %v1543_v47 = vadd.f32 %v1536_v45, %v1476_v40  ;;  %v2647_v49 = vpop.f32.mrb[37].mxu1 }
 0x662   :  { %v1539_v50 = vpop.f32.mrb[38].mxu1 }
 0x663   :  { %v1553_v51 = vadd.f32 %v2359_v46, %v1543_v47  ;;  %v1544_v52 = vadd.f32 %v1539_v50, %v1479_v43  ;;  %v2648_v53 = vpop.f32.mrb[39].mxu1 }
 0x665   :  { %v1554_v55 = vadd.f32 %v2359_v46, %v1544_v52  ;;  %v1555_v56 = vmax.f32 %v1553_v51, 0.0  ;;  %v2766_v46 = vld [vmem:[%s3588_s14 + $0x40] sm:$0xff]   ;;  %v2768_v51 = vld [vmem:[%s3588_s14 + $0x48] sm:$0xff]  }
 0x667   :  { %v1561_v57 = vsel %vm172_vm14, %v1555_v56, 0.0  ;;  %v1556_v58 = vmax.f32 %v1554_v55, 0.0 }
 0x668   :  { %1562 = vadd.xlane.f32.xlu1 %v1561_v57  ;;  %v2770_v57 = vld [vmem:[%s3588_s14 + $0x50] sm:$0xff]  }
 0x669   :  { %v1564_v59 = vsel %vm172_vm14, %v1556_v58, 0.0 }
 0x66a   :  { %1565 = vadd.xlane.f32.xlu0 %v1564_v59 }
 0x680   :  { %1912 = vperm.xlu0 %2724, %v3163_v54  }
 0x6f5   :  { %v1563_v61 = vpop.xlane.xlu1 %1562 }
 0x6f6   :  { %v1567_v62 = vmul.f32 0.03125, %v1563_v61  ;;  %v2771_v61 = vld [vmem:[#allocation2 + $0x88] sm:$0xff]  }
 0x6f7   :  { %v1566_v0 = vpop.xlane.xlu0 %1565 }
 0x6f8   :  { %v1569_v38 = vsub.f32 %v1555_v56, %v1567_v62  ;;  %v1568_v5 = vmul.f32 0.03125, %v1566_v0  ;;  %v2769_v56 = vld [vmem:[#allocation2 + $0x80] sm:$0xff]   ;;  %v2772_v62 = vld [vmem:[%s3588_s14 + $0x58] sm:$0xff]  }
 0x6fa   :  { %v1570_v6 = vsub.f32 %v1556_v58, %v1568_v5  ;;  %v1571_v7 = vmul.f32 %v1569_v38, %v1569_v38  ;;  %v2386_v5 = vld [vmem:[%s3587_s13 + $0x3] ss:$0 sm:$0xff] }
 0x6fc   :  { %v1573_v8 = vsel %vm172_vm14, %v1571_v7, 0.0  ;;  %v1572_v11 = vmul.f32 %v1570_v6, %v1570_v6 }
 0x6fd   :  { %1574 = vadd.xlane.f32.xlu1 %v1573_v8  ;;  %v2776_v8 = vld [vmem:[%s3588_s14 + $0x78] sm:$0xff]  }
 0x6fe   :  { %v1576_v16 = vsel %vm172_vm14, %v1572_v11, 0.0  ;;  %v2415_v11 = vld [vmem:[%s3576_s2] ss:$0 sm:$0xff] }
 0x6ff   :  { %vm2047_vm3 = vcmp.le.s32.totalorder %v2415_v11, %v2969_v3  ;;  %vm2048_vm7 = vcmp.le.s32.totalorder %v2415_v11, %v3392_v17 }
 0x701   :  { %1577 = vadd.xlane.f32.xlu1 %v1576_v16  ;;  %v2416_v16 = vld [vmem:[%s3576_s2 + $0x1] ss:$0 sm:$0xff] }
 0x702   :  { %vm2053_vm4 = vcmp.lt.s32.totalorder %v2964_v2, %v2416_v16  ;;  %vm2054_vm5 = vcmp.lt.s32.totalorder %v2969_v3, %v2416_v16  ;;  %vm2055_vm8 = vcmp.lt.s32.totalorder %v3392_v17, %v2416_v16 }
 0x703   :  { %vm2057_vm10 = vmand %vm2047_vm3, %vm2054_vm5 }
 0x704   :  { %v2418_v19 = vsel %vm2057_vm10, 1.0, %v2852_v1 }
 0x712   :  { %1908 = vperm.xlu1 %2723, %v3168_v35  }
 0x736   :  { %1127 = vadd.xlane.f32.xlu1 %v1126_v25 }
 0x73a   :  { %1130 = vadd.xlane.f32.xlu1 %v1129_v27 }
 0x78a   :  { %v1575_v28 = vpop.xlane.xlu1 %1574 }
 0x78b   :  { %v1579_v63 = vmul.f32 0.03125, %v1575_v28 }
 0x78d   :  { %v1581_v30 = vadd.f32 1e-05, %v1579_v63 }
 0x78e   :  { %v1578_v31 = vpop.xlane.xlu1 %1577 }
 0x78f   :  { %2785 = vrsqrt.f32 %v1581_v30  ;;  %v1580_v4 = vmul.f32 0.03125, %v1578_v31 }
 0x791   :  { %v1582_v32 = vadd.f32 1e-05, %v1580_v4 }
 0x792   :  { %v1909_v7 = vpop.permute.xlu1 %1908 }
 0x793   :  { %2787 = vrsqrt.f32 %v1582_v32  ;;  %vm1915_vm11 = vcmp.lt.f32.partialorder %v2385_v22, %v1909_v7 }
 0x799   :  { %v2786_v33 = vpop.eup %2785 }
 0x79a   :  { %v1585_v34 = vmul.f32 %v2786_v33, %v1569_v38  ;;  %v2774_v38 = vld [vmem:[%s3588_s14 + $0x68] sm:$0xff]  }
 0x79c   :  { %v1593_v40 = vmul.f32 %v2362_v37, %v1585_v34  ;;  %v2272_v34 = vld [vmem:[%s3582_s8] ss:$0 sm:$0xff] }
 0x79d   :  { %v2788_v39 = vpop.eup %2787 }
 0x79e   :  { %v1586_v41 = vmul.f32 %v2788_v39, %v1570_v6  ;;  %v1601_v44 = vadd.f32 %v2363_v42, %v1593_v40  ;;  %v1913_v6 = vpop.permute.xlu0 %1912  ;;  %v2374_v39 = vld [vmem:[%s3582_s8 + $0x2] ss:$0 sm:$0xff] }
 0x7a0   :  { %v1594_v43 = vmul.f32 %v2362_v37, %v1586_v41 }
 0x7a2   :  { %v1602_v45 = vadd.f32 %v2363_v42, %v1594_v43 }
 0x7a4   :  { %v1603_v47 = vpack.c.bf16 %v1602_v45, %v1601_v44  ;;  %v597_v44 = vadd.f32 %v2272_v34, %v3149_v15 }
 0x7a6   :  { %2662 = vmatmul.mubr.msk.bf16.vlgmr.msra.gmra.mrb[24].mxu0 %vm172_vm14, %v1603_v47  ;;  %v1605_v49 = vshrl.u32 %v1603_v47, 16  ;;  %v1608_v50 = vshll.u32 %v1603_v47, 16 }
 0x7a7   :  { %2674 = vmatpush3.bf16.msra.mxu0 %v2766_v46  ;;  %2689 = vmatprep.mubr.msk.bf16.mxu0 %vm2853_vm0, %v2852_v1 }
 0x7a8   :  { %2675 = vmatprep.subr.bf16.mxu0 %v2852_v1  ;;  %v1607_v52 = vrot.slane %v1605_v49, 7  ;;  %v1613_v55 = vrot.slane %v1608_v50, 1 }
 0x7aa   :  { %v1610_v53 = vor.u32 %v1608_v50, %v1607_v52  ;;  %v1614_v60 = vor.u32 %v1613_v55, %v1605_v49 }
 0x7ab   :  { %2676 = vmatpush3.bf16.msra.mxu0 %v2768_v51  ;;  %v598_v51 = vadd.f32 %v2272_v34, %v3151_v18 }
 0x7ac   :  { %2677 = vmatprep.subr.bf16.mxu0 %v2852_v1  ;;  %v1612_v58 = vsel %vm3003_vm9, 0, %v1610_v53  ;;  %v1616_v14 = vsel %vm3021_vm12, %v1614_v60, 0  ;;  %vm1922_vm9 = vcmp.le.f32.partialorder %v1913_v6, %v2386_v5  ;;  %vm1921_vm12 = vcmp.le.f32.partialorder %v1909_v7, %v2386_v5 }
 0x7ad   :  { %v1617_v59 = vsel %vm3039_vm1, 0, %v1612_v58  ;;  %v1618_v0 = vsel %vm3051_vm2, 0, %v1616_v14  ;;  %vm1923_vm15 = vmand %vm1915_vm11, %vm1921_vm12  ;;  %vm2046_vm2 = vcmp.le.s32.totalorder %v2415_v11, %v2964_v2  ;;  %vm2074_vm11 = vcmask 1043456  }
 0x7ae   :  { %2654 = vmatmul.mubr.msk.bf16.vlgmr.msra.gmra.mrb[40].mxu1 %vm172_vm14, %v1617_v59  ;;  %vm2056_vm6 = vmand %vm2046_vm2, %vm2053_vm4 }
 0x7af   :  { %2666 = vmatpush3.bf16.msra.mxu1 %v2769_v56  ;;  %2678 = vmatpush3.bf16.msra.mxu0 %v2770_v57  ;;  %v599_v56 = vmax.f32 %v597_v44, 0.0 }
 0x7b0   :  { %2667 = vmatprep.subr.bf16.mxu1 %v2852_v1  ;;  %2679 = vmatprep.subr.bf16.mxu0 %v2852_v1 }
 0x7b1   :  { %2669 = vmatprep.mubr.msk.bf16.mxu1 %vm2853_vm0, %v2852_v1  ;;  %vm1916_vm0 = vcmp.lt.f32.partialorder %v2385_v22, %v1913_v6  ;;  %v603_v60 = vsel %vm172_vm14, %v599_v56, 0.0 }
 0x7b2   :  { %vm1924_vm13 = vmand %vm1916_vm0, %vm1922_vm9  ;;  %vm2067_vm0 = vcmask 64512  }
 0x7b3   :  { %2668 = vmatpush3.bf16.msra.mxu1 %v2771_v61  ;;  %2680 = vmatpush3.bf16.msra.mxu0 %v2772_v62  ;;  %vm2413_vm1 = vmpackc.low %vm1924_vm13, %vm1923_vm15  ;;  %v600_v61 = vmax.f32 %v598_v51, 0.0  ;;  %v2318_v51 = vld [vmem:[%s3584_s10 + $0x1] ss:$0 sm:$0xff] }
 0x7b4   :  { %2681 = vmatprep.subr.bf16.mxu0 %v2852_v1  ;;  %vm3402_vm9 = vmand %vm2048_vm7, %vm2055_vm8  ;;  %vm669_vm7 = vcmp.gt.f32.partialorder %v3168_v35, 0.5  ;;  %vm670_vm8 = vcmp.gt.f32.partialorder %v3163_v54, 0.5 }
 0x7b5   :  { %v606_v62 = vsel %vm172_vm14, %v600_v61, 0.0  ;;  %v2419_v5 = vsel %vm3402_vm9, 1.0, %v2852_v1 }
 0x7b6   :  { %2670 = vmatmul.mubr.msk.bf16.vlgmr.msra.gmra.mrb[44].mxu1 %vm172_vm14, %v1618_v0 }
 0x7b7   :  { %2682 = vmatpush3.bf16.msra.mxu0 %v2773_v29 }
 0x7b8   :  { %2683 = vmatprep.subr.bf16.mxu0 %v2852_v1 }
 0x7bb   :  { %2684 = vmatpush3.bf16.msra.mxu0 %v2774_v38 }
 0x7bc   :  { %2685 = vmatprep.subr.bf16.mxu0 %v2852_v1 }
 0x7bf   :  { %2686 = vmatpush3.bf16.msra.mxu0 %v2775_v36 }
 0x7c0   :  { %2687 = vmatprep.subr.bf16.mxu0 %v2852_v1 }
 0x7c3   :  { %2688 = vmatpush3.bf16.msra.mxu0 %v2776_v8  ;;  %v1128_v42 = vpop.xlane.xlu1 %1127  ;;  %v2066_v8 = vpack.c.bf16 %v2419_v5, %v2419_v5 }
 0x7c4   :  { %v1132_v52 = vmul.f32 0.03125, %v1128_v42 }
 0x7c6   :  { %2690 = vmatmul.mubr.msk.bf16.vlgmr.msra.gmra.mrb[28].mxu0 %vm2413_vm1, %v2856_v48  ;;  %v2417_v48 = vsel %vm2056_vm6, 1.0, %v2852_v1  ;;  %v3419_v15 = vsub.f32 %v1120_v10, %v1132_v52 }
 0x7c7   :  { %v2065_v21 = vpack.c.bf16 %v2418_v19, %v2417_v48  ;;  %v1131_v57 = vpop.xlane.xlu1 %1130 }
 0x7c8   :  { %v1133_v59 = vmul.f32 0.03125, %v1131_v57  ;;  %v1136_v14 = vmul.f32 %v3419_v15, %v3419_v15 }
 0x7c9   :  { %2695 = vmatprep.mubr.msk.bf16.mxu1 %vm2067_vm0, %v2065_v21 }
 0x7ca   :  { %v3424_v18 = vsub.f32 %v1121_v26, %v1133_v59  ;;  %v1138_v22 = vsel %vm172_vm14, %v1136_v14, 0.0  ;;  %v2424_v14 = vld [vmem:[%s3576_s2 + $0x2] ss:$0 sm:$0xff] }
 0x7cb   :  { %vm2136_vm12 = vcmp.le.s32.totalorder %v2424_v14, %v2964_v2  ;;  %vm2137_vm13 = vcmp.le.s32.totalorder %v2424_v14, %v2969_v3  ;;  %vm2138_vm3 = vcmp.le.s32.totalorder %v2424_v14, %v3392_v17 }
 0x7cc   :  { %v1137_v9 = vmul.f32 %v3424_v18, %v3424_v18 }
 0x879   :  { %v1733_v23 = vpop.f32.mrb[24].mxu0 }
 0x87a   :  { %v2663_v25 = vpop.f32.mrb[25].mxu0 }
 0x87b   :  { %v1736_v27 = vpop.f32.mrb[26].mxu0 }
 0x87c   :  { %v2664_v28 = vpop.f32.mrb[27].mxu0 }
 0x881   :  { %v1678_v63 = vpop.f32.mrb[40].mxu1 }
 0x882   :  { %v1734_v30 = vadd.f32 %v1733_v23, %v1678_v63  ;;  %v2655_v31 = vpop.f32.mrb[41].mxu1 }
 0x883   :  { %v1681_v4 = vpop.f32.mrb[42].mxu1 }
 0x884   :  { %v1737_v32 = vadd.f32 %v1736_v27, %v1681_v4  ;;  %v2656_v33 = vpop.f32.mrb[43].mxu1 }
 0x889   :  { %v1794_v37 = vpop.f32.mrb[44].mxu1 }
 0x88a   :  { %v1801_v40 = vadd.f32 %v1794_v37, %v1734_v30  ;;  %v2671_v41 = vpop.f32.mrb[45].mxu1 }
 0x88b   :  { %v1797_v43 = vpop.f32.mrb[46].mxu1 }
 0x88c   :  { %v1811_v45 = vadd.f32 %v2374_v39, %v1801_v40  ;;  %v1802_v46 = vadd.f32 %v1797_v43, %v1737_v32  ;;  %v2672_v47 = vpop.f32.mrb[47].mxu1 }
 0x88e   :  { %v1812_v49 = vadd.f32 %v2374_v39, %v1802_v46  ;;  %v1813_v50 = vmax.f32 %v1811_v45, 0.0 }
 0x890   :  { %v1819_v53 = vsel %vm172_vm14, %v1813_v50, 0.0  ;;  %v1814_v55 = vmax.f32 %v1812_v49, 0.0  ;;  %v2317_v49 = vld [vmem:[%s3583_s9 + $0x1] ss:$0 sm:$0xff] }
 0x891   :  { %1820 = vadd.xlane.f32.xlu1 %v1819_v53 }
 0x892   :  { %v1822_v58 = vsel %vm172_vm14, %v1814_v55, 0.0 }
 0x893   :  { %1823 = vadd.xlane.f32.xlu0 %v1822_v58 }
 0x895   :  { %604 = vadd.xlane.f32.xlu1 %v603_v60 }
 0x899   :  { %v2029_v29 = vpop.f32.mrb[28].mxu0  ;;  %607 = vadd.xlane.f32.xlu1 %v606_v62 }
 0x89a   :  { %v2691_v0 = vpop.f32.mrb[29].mxu0  ;;  %v2036_v10 = vadd.f32 %v2029_v29, %v3255_v12  ;;  %v1141_v12 = vsel %vm172_vm14, %v1137_v9, 0.0  ;;  %v2425_v29 = vld [vmem:[%s3576_s2 + $0x3] ss:$0 sm:$0xff] }
 0x89b   :  { %v2032_v24 = vpop.f32.mrb[30].mxu0  ;;  %vm2143_vm15 = vcmp.lt.s32.totalorder %v2964_v2, %v2425_v29  ;;  %vm2144_vm1 = vcmp.lt.s32.totalorder %v2969_v3, %v2425_v29  ;;  %vm2145_vm4 = vcmp.lt.s32.totalorder %v3392_v17, %v2425_v29 }
 0x89c   :  { %v2037_v38 = vadd.f32 %v2032_v24, %v3258_v13  ;;  %v2692_v26 = vpop.f32.mrb[31].mxu0  ;;  %vm2146_vm2 = vmand %vm2136_vm12, %vm2143_vm15 }
 0x89d   :  { %1139 = vadd.xlane.f32.xlu1 %v1138_v22  ;;  %vm2147_vm5 = vmand %vm2137_vm13, %vm2144_vm1 }
 0x89e   :  { %v2038_v6 = vpack.c.bf16 %v2037_v38, %v2036_v10  ;;  %v2427_v0 = vsel %vm2147_vm5, 1.0, %v2852_v1  ;;  %vm2148_vm6 = vmand %vm2138_vm3, %vm2145_vm4 }
 0x89f   :  { %v2428_v10 = vsel %vm2148_vm6, 1.0, %v2852_v1 }
 0x8a0   :  { %v2158_v36 = vrot.slane %v2038_v6, 4  ;;  %2705 = vmatprep.subr.msk.bf16.mxu1 %vm2074_vm11, %v2038_v6  ;;  %v2076_v7 = vsel %vm2074_vm11, %v2038_v6, 0  ;;  %v2156_v38 = vpack.c.bf16 %v2428_v10, %v2428_v10 }
 0x8a1   :  { %2694 = vmatpush3.bf16.msra.mxu1 %v2076_v7  ;;  %1142 = vadd.xlane.f32.xlu1 %v1141_v12 }
 0x8a2   :  { %2706 = vmatprep.subr.msk.bf16.mxu1 %vm2074_vm11, %v2158_v36  ;;  %v2166_v13 = vsel %vm2074_vm11, %v2158_v36, 0 }
 0x8a4   :  { %2696 = vmatmul.mubr.msk.bf16.vlgmr.msra.gmra.mrb[48].mxu1 %vm2067_vm0, %v2066_v8 }
 0x8a5   :  { %2700 = vmatpush3.bf16.msra.mxu1 %v2166_v13  ;;  %v2377_v13 = vld [vmem:[%s3583_s9 + $0x2] ss:$0 sm:$0xff] }
 0x91e   :  { %v1821_v11 = vpop.xlane.xlu1 %1820 }
 0x91f   :  { %v1825_v16 = vmul.f32 0.03125, %v1821_v11 }
 0x920   :  { %v1824_v48 = vpop.xlane.xlu0 %1823 }
 0x921   :  { %v3439_v19 = vsub.f32 %v1813_v50, %v1825_v16  ;;  %v1826_v20 = vmul.f32 0.03125, %v1824_v48  ;;  %v2378_v16 = vld [vmem:[%s3584_s10 + $0x2] ss:$0 sm:$0xff] }
 0x922   :  { %v605_v21 = vpop.xlane.xlu1 %604 }
 0x923   :  { %v3441_v23 = vsub.f32 %v1814_v55, %v1826_v20  ;;  %v609_v25 = vmul.f32 0.03125, %v605_v21  ;;  %v1829_v27 = vmul.f32 %v3439_v19, %v3439_v19  ;;  %v2320_v55 = vld [vmem:[%s3585_s11 + $0x1] ss:$0 sm:$0xff]  ;;  %v2380_v21 = vld [vmem:[%s3585_s11 + $0x2] ss:$0 sm:$0xff] }
 0x925   :  { %v3445_v28 = vsub.f32 %v599_v56, %v609_v25  ;;  %v1831_v63 = vsel %vm172_vm14, %v1829_v27, 0.0  ;;  %v1830_v30 = vmul.f32 %v3441_v23, %v3441_v23 }
 0x926   :  { %1832 = vadd.xlane.f32.xlu1 %v1831_v63  ;;  %v608_v31 = vpop.xlane.xlu1 %607 }
 0x927   :  { %v610_v4 = vmul.f32 0.03125, %v608_v31  ;;  %v1834_v33 = vsel %vm172_vm14, %v1830_v30, 0.0  ;;  %v613_v34 = vmul.f32 %v3445_v28, %v3445_v28 }
 0x929   :  { %v3450_v32 = vsub.f32 %v600_v61, %v610_v4  ;;  %v615_v43 = vsel %vm172_vm14, %v613_v34, 0.0 }
 0x92a   :  { %v1140_v37 = vpop.xlane.xlu1 %1139  ;;  %1835 = vadd.xlane.f32.xlu1 %v1834_v33 }
 0x92b   :  { %v1144_v39 = vmul.f32 0.03125, %v1140_v37  ;;  %v614_v40 = vmul.f32 %v3450_v32, %v3450_v32 }
 0x92d   :  { %v1146_v41 = vadd.f32 1e-05, %v1144_v39  ;;  %v618_v42 = vsel %vm172_vm14, %v614_v40, 0.0  ;;  %v2274_v39 = vld [vmem:[%s3584_s10] ss:$0 sm:$0xff] }
 0x92e   :  { %v1143_v44 = vpop.xlane.xlu1 %1142  ;;  %619 = vadd.xlane.f32.xlu0 %v618_v42  ;;  %616 = vadd.xlane.f32.xlu1 %v615_v43  ;;  %v2275_v42 = vld [vmem:[%s3585_s11] ss:$0 sm:$0xff]  ;;  %s2858_s11 = smov 1  }
 0x92f   :  { %2789 = vrsqrt.f32 %v1146_v41  ;;  %v1145_v45 = vmul.f32 0.03125, %v1143_v44 }
 0x931   :  { %v1147_v46 = vadd.f32 1e-05, %v1145_v45 }
 0x933   :  { %2791 = vrsqrt.f32 %v1147_v46 }
 0x939   :  { %v2790_v47 = vpop.eup %2789 }
 0x93a   :  { %v1150_v50 = vmul.f32 %v2790_v47, %v3419_v15 }
 0x93c   :  { %v1158_v52 = vmul.f32 %v2317_v49, %v1150_v50 }
 0x93d   :  { %v2792_v53 = vpop.eup %2791 }
 0x93e   :  { %v1166_v56 = vadd.f32 %v2318_v51, %v1158_v52  ;;  %v1151_v57 = vmul.f32 %v2792_v53, %v3424_v18  ;;  %v2426_v18 = vsel %vm2146_vm2, 1.0, %v2852_v1 }
 0x93f   :  { %v2155_v24 = vpack.c.bf16 %v2427_v0, %v2426_v18 }
 0x940   :  { %v1176_v58 = vmul.f32 %v2320_v55, %v1166_v56  ;;  %v1159_v59 = vmul.f32 %v2317_v49, %v1151_v57 }
 0x941   :  { %2701 = vmatprep.mubr.msk.bf16.mxu1 %vm2067_vm0, %v2155_v24 }
 0x942   :  { %v1178_v60 = vsel %vm172_vm14, %v1176_v58, 0.0  ;;  %v1167_v61 = vadd.f32 %v2318_v51, %v1159_v59  ;;  %2702 = vmatmul.mubr.msk.bf16.vlgmr.msra.gmra.mrb[52].mxu1 %vm2067_vm0, %v2156_v38 }
 0x943   :  { %1179 = vadd.xlane.f32.xlu1 %v1178_v60 }
 0x944   :  { %v1177_v15 = vmul.f32 %v2320_v55, %v1167_v61 }
 0x946   :  { %v1181_v62 = vsel %vm172_vm14, %v1177_v15, 0.0 }
 0x947   :  { %1182 = vadd.xlane.f32.xlu0 %v1181_v62 }
 0x977   :  { %v2697_v57 = vpop.f32.mrb[48].mxu1 }
 0x978   :  { %2128 = vst.msk [vmem:[#allocation5 + $0x10] sm:$0xff] %vm172_vm14, %v2697_v57  ;;  %v2112_v58 = vpop.f32.mrb[49].mxu1 }
 0x979   :  { %2126 = vst.msk [vmem:[#allocation5] sm:$0xff] %vm172_vm14, %v2112_v58  ;;  %v2698_v59 = vpop.f32.mrb[50].mxu1 }
 0x97a   :  { %v2115_v61 = vpop.f32.mrb[51].mxu1 }
 0x97b   :  { %2127 = vst.msk [vmem:[#allocation5 + $0x8] sm:$0xff] %vm172_vm14, %v2115_v61 }
 0x9b3   :  { %v1833_v2 = vpop.xlane.xlu1 %1832 }
 0x9b4   :  { %v1837_v3 = vmul.f32 0.03125, %v1833_v2 }
 0x9b6   :  { %v1839_v22 = vadd.f32 1e-05, %v1837_v3 }
 0x9b7   :  { %v1836_v9 = vpop.xlane.xlu1 %1835 }
 0x9b8   :  { %2793 = vrsqrt.f32 %v1839_v22  ;;  %v1838_v17 = vmul.f32 0.03125, %v1836_v9 }
 0x9ba   :  { %v1840_v26 = vadd.f32 1e-05, %v1838_v17 }
 0x9bb   :  { %v617_v5 = vpop.xlane.xlu1 %616  ;;  %v620_v6 = vpop.xlane.xlu0 %619 }
 0x9bc   :  { %2795 = vrsqrt.f32 %v1840_v26  ;;  %v621_v36 = vmul.f32 0.03125, %v617_v5  ;;  %v622_v7 = vmul.f32 0.03125, %v620_v6 }
 0x9be   :  { %v623_v12 = vadd.f32 1e-05, %v621_v36  ;;  %v624_v8 = vadd.f32 1e-05, %v622_v7 }
 0x9c0   :  { %2797 = vrsqrt.f32 %v623_v12 }
 0x9c1   :  { %2799 = vrsqrt.f32 %v624_v8 }
 0x9c2   :  { %v2794_v1 = vpop.eup %2793 }
 0x9c3   :  { %v1843_v11 = vmul.f32 %v2794_v1, %v3439_v19  ;;  %v2273_v19 = vld [vmem:[%s3583_s9] ss:$0 sm:$0xff] }
 0x9c5   :  { %v1851_v48 = vmul.f32 %v2377_v13, %v1843_v11 }
 0x9c6   :  { %v2796_v20 = vpop.eup %2795 }
 0x9c7   :  { %v1859_v25 = vadd.f32 %v2378_v16, %v1851_v48  ;;  %v1844_v27 = vmul.f32 %v2796_v20, %v3441_v23 }
 0x9c9   :  { %v1869_v63 = vmul.f32 %v2380_v21, %v1859_v25  ;;  %v1852_v30 = vmul.f32 %v2377_v13, %v1844_v27 }
 0x9ca   :  { %v2798_v31 = vpop.eup %2797 }
 0x9cb   :  { %v2800_v4 = vpop.eup %2799  ;;  %v1871_v33 = vsel %vm172_vm14, %v1869_v63, 0.0  ;;  %v1860_v34 = vadd.f32 %v2378_v16, %v1852_v30  ;;  %v627_v37 = vmul.f32 %v2798_v31, %v3445_v28 }
 0x9cc   :  { %1872 = vadd.xlane.f32.xlu1 %v1871_v33  ;;  %v628_v23 = vmul.f32 %v2800_v4, %v3450_v32  ;;  %v2322_v32 = vld [vmem:[%s3586_s12 + $0x1] ss:$0 sm:$0xff] }
 0x9cd   :  { %v1870_v40 = vmul.f32 %v2380_v21, %v1860_v34  ;;  %v635_v41 = vmul.f32 %v2273_v19, %v627_v37 }
 0x9ce   :  { %v636_v43 = vmul.f32 %v2273_v19, %v628_v23 }
 0x9cf   :  { %v1874_v44 = vsel %vm172_vm14, %v1870_v40, 0.0  ;;  %v643_v45 = vadd.f32 %v2274_v39, %v635_v41 }
 0x9d0   :  { %1875 = vadd.xlane.f32.xlu0 %v1874_v44  ;;  %v644_v46 = vadd.f32 %v2274_v39, %v636_v43  ;;  %v1180_v51 = vpop.xlane.xlu1 %1179 }
 0x9d1   :  { %v652_v28 = vmul.f32 %v2275_v42, %v643_v45  ;;  %v1192_v52 = vadd.f32 %v2322_v32, %v1180_v51 }
 0x9d2   :  { %v653_v47 = vmul.f32 %v2275_v42, %v644_v46 }
 0x9d3   :  { %v654_v49 = vsel %vm172_vm14, %v652_v28, 0.0  ;;  %v1194_v55 = vsel %vm669_vm7, 0.0, %v1192_v52 }
 0x9d4   :  { %655 = vadd.xlane.f32.xlu1 %v654_v49  ;;  %v657_v50 = vsel %vm172_vm14, %v653_v47, 0.0  ;;  %v1183_v53 = vpop.xlane.xlu0 %1182 }
 0x9d5   :  { %658 = vadd.xlane.f32.xlu0 %v657_v50  ;;  %v1193_v56 = vadd.f32 %v2322_v32, %v1183_v53 }
 0x9d7   :  { %v1195_v60 = vsel %vm670_vm8, 0.0, %v1193_v56 }
 0x9e5   :  { %1198 = vrot.lane.b32.xlu1 %v1194_v55, %s2858_s11 }
 0x9eb   :  { %1200 = vrot.lane.b32.xlu0 %v1195_v60, %s2858_s11 }
 0xa15   :  { %v2703_v15 = vpop.f32.mrb[52].mxu1 }
 0xa16   :  { %2219 = vst.msk [vmem:[#allocation5 + $0x28] sm:$0xff] %vm172_vm14, %v2703_v15  ;;  %v2202_v62 = vpop.f32.mrb[53].mxu1 }
 0xa17   :  { %2217 = vst.msk [vmem:[#allocation5 + $0x18] sm:$0xff] %vm172_vm14, %v2202_v62  ;;  %v2704_v14 = vpop.f32.mrb[54].mxu1 }
 0xa18   :  { %v2205_v29 = vpop.f32.mrb[55].mxu1 }
 0xa19   :  { %2218 = vst.msk [vmem:[#allocation5 + $0x20] sm:$0xff] %vm172_vm14, %v2205_v29 }
 0xa1a   :  { %2834 = shalt.err (!%p2831_p12)
}
 0xa1b   :  { %s2835_s23 = scalar_lea.hbm %s3589_s15, 768 }
 0xa1c   :  { %p2836_p13 = scmp.ne.s32.totalorder %s3589_s15, %s2835_s23  ;;  %p2839_p0 = scmp.lt.u32.totalorder %s2835_s23, %s3589_s15 }
 0xa1e   :  { %p2841_p1 = pnand %p2839_p0, %p2836_p13 }
 0xa20   :  { %2844 = shalt.err (!%p2841_p1)
}
 0xa21   :  { %s2860_s1 = smov 128   ;;  %s2861_s28 = smov 8   ;;  %v2382_v18 = vld [vmem:[%s3586_s12 + $0x2] ss:$0 sm:$0xff]  ;;  %v2276_v3 = vld [vmem:[%s3586_s12] ss:$0 sm:$0xff] }
 0xa22   :  { %2231 = dma.vmem_to_hbm [thread:$0]  %s2226_s21, 768, %s3589_s15, [#allocation4], %s2860_s1, %s2860_s1, %s2861_s28   ;;  %vm673_vm14 = vcmask 7168   ;;  %vm1204_vm10 = vcmask 15368   ;;  %vm1897_vm0 = vcmask 23568  }
 0xa23   :  { %s2862_s30 = smov 2  }
 0xa59   :  { %v1873_v0 = vpop.xlane.xlu1 %1872 }
 0xa5a   :  { %v1885_v24 = vadd.f32 %v2382_v18, %v1873_v0 }
 0xa5c   :  { %v1887_v10 = vsel %vm669_vm7, 0.0, %v1885_v24 }
 0xa5d   :  { %1891 = vrot.lane.b32.xlu1 %v1887_v10, %s2862_s30  ;;  %v1876_v38 = vpop.xlane.xlu0 %1875 }
 0xa5e   :  { %v1886_v2 = vadd.f32 %v2382_v18, %v1876_v38 }
 0xa60   :  { %v1888_v22 = vsel %vm670_vm8, 0.0, %v1886_v2 }
 0xa61   :  { %v656_v9 = vpop.xlane.xlu1 %655  ;;  %1893 = vrot.lane.b32.xlu1 %v1888_v22, %s2862_s30 }
 0xa62   :  { %v667_v17 = vadd.f32 %v2276_v3, %v656_v9  ;;  %v659_v26 = vpop.xlane.xlu0 %658 }
 0xa63   :  { %v668_v5 = vadd.f32 %v2276_v3, %v659_v26 }
 0xa64   :  { %v671_v6 = vsel %vm669_vm7, 0.0, %v667_v17 }
 0xa65   :  { %674 = vst.msk [vmem:[%s3590_s16] sm:$0xff] %vm673_vm14, %v671_v6  ;;  %v672_v36 = vsel %vm670_vm8, 0.0, %v668_v5  ;;  %v1199_v7 = vpop.permute.xlu1 %1198 }
 0xa66   :  { %675 = vst.msk [vmem:[%s3590_s16 + $0x8] sm:$0xff] %vm673_vm14, %v672_v36  ;;  %v1201_v12 = vpop.permute.xlu0 %1200 }
 0xa67   :  { %1205 = vst.msk [vmem:[%s3590_s16] sm:$0xff] %vm1204_vm10, %v1199_v7  ;;  %1206 = vst.msk [vmem:[%s3590_s16 + $0x8] sm:$0xff] %vm1204_vm10, %v1201_v12 }
 0xacf   :  { %v1892_v35 = vpop.permute.xlu1 %1891 }
 0xad0   :  { %1898 = vst.msk [vmem:[%s3590_s16] sm:$0xff] %vm1897_vm0, %v1892_v35 }
 0xad3   :  { %v1894_v54 = vpop.permute.xlu1 %1893 }
 0xad4   :  { %1899 = vst.msk [vmem:[%s3590_s16 + $0x8] sm:$0xff] %vm1897_vm0, %v1894_v54 }
 0xad5   :  { %2847 = dma.done.wait [#allocation4], 768  }
 0xad6   :  { %2848 = vsyncadd [#allocation4], 4294966528 }
 0xad7   :  { %2239 = vsyncpa [#allocation3], 1 }
 0xad8   :  { %2240 = vsyncpa [#allocation4], 1 }

</bundles_post_ra>
